<compile_context>
chip_gen: v7x
topology: tpu7x:2x2x1
jax: 0.10.0
libtpu: 0.0.40
codegen_flags: <defaults>
</compile_context>

<pallas_src>
import math
import jax
import jax.numpy as jnp
from jax import lax
from jax.experimental import pallas as pl
from jax.experimental.pallas import tpu as pltpu


def _lstm_kernel(xw_ref, u_ref, seq_ref, h_ref, c_ref):
    """One grid step = one (batch_block, T_CHUNK) tile of the recurrence.

    xw_ref : (T_CHUNK, batch_block, 4*HS) f32   precomputed x@W + bias
    u_ref  : (HS, 4*HS)                bf16     recurrent weights
    seq_ref: (batch_block, T_CHUNK, HS) out     hidden_seq slice (consumer layout)
    h_ref  : (batch_block, HS)          out     recurrent h state (VMEM resident)
    c_ref  : (batch_block, HS)          out     recurrent c state (VMEM resident)
    """
    chunk = pl.program_id(1)   # time-chunk index ('arbitrary' axis)

    # Zero-init the recurrent state at the first time chunk (init_states=None).
    @pl.when(chunk == 0)
    def _():
        h_ref[...] = jnp.zeros_like(h_ref)
        c_ref[...] = jnp.zeros_like(c_ref)

    HS = h_ref.shape[-1]
    t_chunk = xw_ref.shape[0]
    u = u_ref[...]                       # bf16 (HS, 4*HS), loaded once per chunk

    def step(i, carry):
        # Recurrent projection only: (bs_blk, HS) @ (HS, 4*HS) on the MXU,
        # bf16 operands, f32 accumulation.
        gates = xw_ref[i] + jnp.dot(h_ref[...].astype(u.dtype), u,
                                    preferred_element_type=jnp.float32)

        i_t = jax.nn.sigmoid(gates[:, 0 * HS:1 * HS])
        f_t = jax.nn.sigmoid(gates[:, 1 * HS:2 * HS])
        g_t = jnp.tanh(gates[:, 2 * HS:3 * HS])
        o_t = jax.nn.sigmoid(gates[:, 3 * HS:4 * HS])

        c_new = f_t * c_ref[...] + i_t * g_t
        h_new = o_t * jnp.tanh(c_new)

        c_ref[...] = c_new
        h_ref[...] = h_new
        # hidden_seq is laid out (batch, seq, HS); write this timestep's row.
        seq_ref[:, pl.ds(i, 1), :] = h_new[:, None, :].astype(seq_ref.dtype)
        return carry

    # Short fixed trip count -> fully unrolled for LLO scheduler visibility.
    lax.fori_loop(0, t_chunk, step, 0, unroll=True)


def naive_lstm_forward(x, W, U, bias, *, t_chunk=8, batch_block=None,
                       compute_dtype=jnp.bfloat16):
    """x: (batch, seq, input_size). Returns (hidden_seq, (h_t, c_t))."""
    bs, seq, in_size = x.shape
    hs4 = W.shape[1]
    HS = hs4 // 4

    if batch_block is None:
        batch_block = bs
    assert seq % t_chunk == 0, "seq must be divisible by t_chunk"
    assert bs % batch_block == 0, "batch must be divisible by batch_block"

    # ---- Hoisted input projection: ONE big MXU matmul instead of `seq` tiny
    # ones on the serial critical path.  bf16 operands, f32 accumulation.
    x_tm = jnp.transpose(x, (1, 0, 2))                       # (seq, bs, in)
    xw = jnp.dot(x_tm.astype(compute_dtype), W.astype(compute_dtype),
                 preferred_element_type=jnp.float32)
    xw = xw + bias.astype(jnp.float32)                       # (seq, bs, 4*HS)

    u_c = U.astype(compute_dtype)                            # bf16 weights

    grid = (bs // batch_block, seq // t_chunk)               # (parallel, arbitrary)

    grid_spec = pltpu.PrefetchScalarGridSpec(
        num_scalar_prefetch=0,
        grid=grid,
        in_specs=[
            # Precomputed input projection, time-major chunk.
            pl.BlockSpec((t_chunk, batch_block, hs4), lambda b, c: (c, b, 0)),
            # Recurrent weights: constant block across the whole grid.
            # (On v7x at large HS: add pipeline_mode=pl.Buffered(1) here.)
            pl.BlockSpec((HS, hs4), lambda b, c: (0, 0)),
        ],
        out_specs=[
            # hidden_seq directly in (batch, seq, HS) layout -> no transpose.
            pl.BlockSpec((batch_block, t_chunk, HS), lambda b, c: (b, c, 0)),
            # h_t / c_t: constant block index along the time axis => these
            # output blocks stay VMEM-resident and double as the state.
            pl.BlockSpec((batch_block, HS), lambda b, c: (b, 0)),
            pl.BlockSpec((batch_block, HS), lambda b, c: (b, 0)),
        ],
    )

    hidden_seq, h_t, c_t = pl.pallas_call(
        _lstm_kernel,
        out_shape=(
            jax.ShapeDtypeStruct((bs, seq, HS), x.dtype),
            jax.ShapeDtypeStruct((bs, HS), x.dtype),
            jax.ShapeDtypeStruct((bs, HS), x.dtype),
        ),
        grid_spec=grid_spec,
        compiler_params=pltpu.CompilerParams(
            # batch blocks are independent recurrences (megacore-parallel on
            # v7x); the time axis is a sequential recurrence.
            dimension_semantics=("parallel", "arbitrary"),
        ),
    )(xw, u_c)

    return hidden_seq, (h_t, c_t)


def _reference_lstm(x, W, U, bias, compute_dtype=jnp.bfloat16):
    """Pure-JAX reference using the same bf16-operand / f32-accum numerics."""
    bs, seq, _ = x.shape
    HS = W.shape[1] // 4
    Wc = W.astype(compute_dtype)
    Uc = U.astype(compute_dtype)
    h = jnp.zeros((bs, HS), jnp.float32)
    c = jnp.zeros((bs, HS), jnp.float32)
    outs = []
    for t in range(seq):
        g = (jnp.dot(x[:, t, :].astype(compute_dtype), Wc,
                     preferred_element_type=jnp.float32)
             + jnp.dot(h.astype(compute_dtype), Uc,
                       preferred_element_type=jnp.float32)
             + bias)
        i = jax.nn.sigmoid(g[:, :HS])
        f = jax.nn.sigmoid(g[:, HS:2 * HS])
        gg = jnp.tanh(g[:, 2 * HS:3 * HS])
        o = jax.nn.sigmoid(g[:, 3 * HS:])
        c = f * c + i * gg
        h = o * jnp.tanh(c)
        outs.append(h)
    return jnp.stack(outs, axis=1), (h, c)


if __name__ == "__main__":
    batch, seq, input_size, hidden_size = 8, 16, 16, 32

    key = jax.random.PRNGKey(0)
    kx, kw, ku, kb = jax.random.split(key, 4)

    stdv = 1.0 / math.sqrt(hidden_size)
    W = jax.random.uniform(kw, (input_size, hidden_size * 4),
                           jnp.float32, -stdv, stdv)
    U = jax.random.uniform(ku, (hidden_size, hidden_size * 4),
                           jnp.float32, -stdv, stdv)
    bias = jax.random.uniform(kb, (hidden_size * 4,),
                              jnp.float32, -stdv, stdv)
    x = jax.random.normal(kx, (batch, seq, input_size), jnp.float32)

    fwd = jax.jit(naive_lstm_forward)
    hidden_seq, (h_t, c_t) = fwd(x, W, U, bias)
    jax.block_until_ready((hidden_seq, h_t, c_t))

    ref_seq, (ref_h, ref_c) = _reference_lstm(x, W, U, bias)
    assert hidden_seq.shape == (batch, seq, hidden_size)
    assert h_t.shape == (batch, hidden_size)
    assert c_t.shape == (batch, hidden_size)
    assert jnp.allclose(hidden_seq, ref_seq, atol=5e-3), \
        float(jnp.max(jnp.abs(hidden_seq - ref_seq)))
    assert jnp.allclose(h_t, ref_h, atol=5e-3)
    assert jnp.allclose(c_t, ref_c, atol=5e-3)

    print("KERNEL_OK")
</pallas_src>

<mosaic_0001>
module attributes {stable_mosaic.version = 11 : i64} {
  func.func @_lstm_kernel(%arg0: i32, %arg1: i32, %arg2: memref<8x8x128xf32, #tpu.memory_space<vmem>>, %arg3: memref<32x128xbf16, #tpu.memory_space<vmem>>, %arg4: memref<8x8x32xf32, #tpu.memory_space<vmem>>, %arg5: memref<8x32xf32, #tpu.memory_space<vmem>>, %arg6: memref<8x32xf32, #tpu.memory_space<vmem>>) attributes {dimension_semantics = [#tpu.dimension_semantics<parallel>, #tpu.dimension_semantics<arbitrary>], iteration_bounds = array<i64: 1, 2>, scalar_prefetch = 0 : i64, scratch_operands = 0 : i64, tpu.core_type = #tpu.core_type<tc>, window_params = [{transform_indices = @transform_0, window_bounds = array<i64: 8, 8, 128>}, {pipeline_mode = #tpu.pipeline_mode<synchronous>, transform_indices = @transform_1, window_bounds = array<i64: 32, 128>}, {transform_indices = @transform_2, window_bounds = array<i64: 8, 8, 32>}, {transform_indices = @transform_3, window_bounds = array<i64: 8, 32>}, {transform_indices = @transform_4, window_bounds = array<i64: 8, 32>}]} {
    %c0_i32 = arith.constant 0 : i32
    %0 = arith.cmpi eq, %arg1, %c0_i32 : i32
    %1 = arith.extui %0 : i1 to i32
    %c0_i32_0 = arith.constant 0 : i32
    %2 = arith.cmpi ne, %1, %c0_i32_0 : i32
    scf.if %2 {
      %cst_130 = arith.constant 0.000000e+00 : f32
      %308 = vector.broadcast %cst_130 : f32 to vector<8x32xf32>
      %c0_131 = arith.constant 0 : index
      %c0_132 = arith.constant 0 : index
      %309 = vector.load %arg5[%c0_131, %c0_132] : memref<8x32xf32, #tpu.memory_space<vmem>>, vector<8x32xf32>
      tpu.vector_store %arg5[%c0_131, %c0_132], %308 {strides = array<i32>} : memref<8x32xf32, #tpu.memory_space<vmem>>, vector<8x32xf32>,
      %cst_133 = arith.constant 0.000000e+00 : f32
      %310 = vector.broadcast %cst_133 : f32 to vector<8x32xf32>
      %c0_134 = arith.constant 0 : index
      %c0_135 = arith.constant 0 : index
      %311 = vector.load %arg6[%c0_134, %c0_135] : memref<8x32xf32, #tpu.memory_space<vmem>>, vector<8x32xf32>
      tpu.vector_store %arg6[%c0_134, %c0_135], %310 {strides = array<i32>} : memref<8x32xf32, #tpu.memory_space<vmem>>, vector<8x32xf32>,
    } else {
    }
    %c0 = arith.constant 0 : index
    %c0_1 = arith.constant 0 : index
    %3 = vector.load %arg3[%c0, %c0_1] : memref<32x128xbf16, #tpu.memory_space<vmem>>, vector<32x128xbf16>
    %c0_i32_2 = arith.constant 0 : i32
    %4 = arith.index_cast %c0_i32_2 : i32 to index
    %c0_3 = arith.constant 0 : index
    %c0_4 = arith.constant 0 : index
    %5 = vector.load %arg2[%4, %c0_3, %c0_4] : memref<8x8x128xf32, #tpu.memory_space<vmem>>, vector<1x8x128xf32>
    %6 = vector.shape_cast %5 : vector<1x8x128xf32> to vector<8x128xf32>
    %c0_5 = arith.constant 0 : index
    %c0_6 = arith.constant 0 : index
    %7 = vector.load %arg5[%c0_5, %c0_6] : memref<8x32xf32, #tpu.memory_space<vmem>>, vector<8x32xf32>
    %8 = arith.truncf %7 : vector<8x32xf32> to vector<8x32xbf16>
    %cst = arith.constant dense<0.000000e+00> : vector<8x128xf32>
    %9 = tpu.matmul %8, %3, %cst {dimension_numbers = #tpu.dot_dimension_numbers<[1], [0], [0], [1], [0, 0, 1, 1], [], []>} : vector<8x32xbf16>, vector<32x128xbf16>, vector<8x128xf32> -> vector<8x128xf32>
    %10 = arith.addf %6, %9 : vector<8x128xf32>
    %11 = vector.extract_strided_slice %10 {offsets = [0, 0], sizes = [8, 32], strides = [1, 1]} : vector<8x128xf32> to vector<8x32xf32>
    %12 = arith.negf %11 : vector<8x32xf32>
    %13 = math.exp %12 : vector<8x32xf32>
    %cst_7 = arith.constant 1.000000e+00 : f32
    %14 = vector.broadcast %cst_7 : f32 to vector<8x32xf32>
    %15 = arith.addf %14, %13 : vector<8x32xf32>
    %16 = arith.divf %14, %15 : vector<8x32xf32>
    %17 = vector.extract_strided_slice %10 {offsets = [0, 32], sizes = [8, 32], strides = [1, 1]} : vector<8x128xf32> to vector<8x32xf32>
    %18 = arith.negf %17 : vector<8x32xf32>
    %19 = math.exp %18 : vector<8x32xf32>
    %cst_8 = arith.constant 1.000000e+00 : f32
    %20 = vector.broadcast %cst_8 : f32 to vector<8x32xf32>
    %21 = arith.addf %20, %19 : vector<8x32xf32>
    %22 = arith.divf %20, %21 : vector<8x32xf32>
    %23 = vector.extract_strided_slice %10 {offsets = [0, 64], sizes = [8, 32], strides = [1, 1]} : vector<8x128xf32> to vector<8x32xf32>
    %24 = math.tanh %23 : vector<8x32xf32>
    %25 = vector.extract_strided_slice %10 {offsets = [0, 96], sizes = [8, 32], strides = [1, 1]} : vector<8x128xf32> to vector<8x32xf32>
    %26 = arith.negf %25 : vector<8x32xf32>
    %27 = math.exp %26 : vector<8x32xf32>
    %cst_9 = arith.constant 1.000000e+00 : f32
    %28 = vector.broadcast %cst_9 : f32 to vector<8x32xf32>
    %29 = arith.addf %28, %27 : vector<8x32xf32>
    %30 = arith.divf %28, %29 : vector<8x32xf32>
    %c0_10 = arith.constant 0 : index
    %c0_11 = arith.constant 0 : index
    %31 = vector.load %arg6[%c0_10, %c0_11] : memref<8x32xf32, #tpu.memory_space<vmem>>, vector<8x32xf32>
    %32 = arith.mulf %22, %31 : vector<8x32xf32>
    %33 = arith.mulf %16, %24 : vector<8x32xf32>
    %34 = arith.addf %32, %33 : vector<8x32xf32>
    %35 = math.tanh %34 : vector<8x32xf32>
    %36 = arith.mulf %30, %35 : vector<8x32xf32>
    %c0_12 = arith.constant 0 : index
    %c0_13 = arith.constant 0 : index
    %37 = vector.load %arg6[%c0_12, %c0_13] : memref<8x32xf32, #tpu.memory_space<vmem>>, vector<8x32xf32>
    tpu.vector_store %arg6[%c0_12, %c0_13], %34 {strides = array<i32>} : memref<8x32xf32, #tpu.memory_space<vmem>>, vector<8x32xf32>,
    %c0_14 = arith.constant 0 : index
    %c0_15 = arith.constant 0 : index
    %38 = vector.load %arg5[%c0_14, %c0_15] : memref<8x32xf32, #tpu.memory_space<vmem>>, vector<8x32xf32>
    tpu.vector_store %arg5[%c0_14, %c0_15], %36 {strides = array<i32>} : memref<8x32xf32, #tpu.memory_space<vmem>>, vector<8x32xf32>,
    %39 = vector.shape_cast %36 : vector<8x32xf32> to vector<8x1x32xf32>
    %c0_16 = arith.constant 0 : index
    %40 = arith.index_cast %c0_i32_2 : i32 to index
    %c0_17 = arith.constant 0 : index
    %41 = vector.load %arg4[%c0_16, %40, %c0_17] : memref<8x8x32xf32, #tpu.memory_space<vmem>>, vector<8x1x32xf32>
    tpu.vector_store %arg4[%c0_16, %40, %c0_17], %39 {strides = array<i32>} : memref<8x8x32xf32, #tpu.memory_space<vmem>>, vector<8x1x32xf32>,
    %c1_i32 = arith.constant 1 : i32
    %42 = arith.index_cast %c1_i32 : i32 to index
    %c0_18 = arith.constant 0 : index
    %c0_19 = arith.constant 0 : index
    %43 = vector.load %arg2[%42, %c0_18, %c0_19] : memref<8x8x128xf32, #tpu.memory_space<vmem>>, vector<1x8x128xf32>
    %44 = vector.shape_cast %43 : vector<1x8x128xf32> to vector<8x128xf32>
    %c0_20 = arith.constant 0 : index
    %c0_21 = arith.constant 0 : index
    %45 = vector.load %arg5[%c0_20, %c0_21] : memref<8x32xf32, #tpu.memory_space<vmem>>, vector<8x32xf32>
    %46 = arith.truncf %45 : vector<8x32xf32> to vector<8x32xbf16>
    %cst_22 = arith.constant dense<0.000000e+00> : vector<8x128xf32>
    %47 = tpu.matmul %46, %3, %cst_22 {dimension_numbers = #tpu.dot_dimension_numbers<[1], [0], [0], [1], [0, 0, 1, 1], [], []>} : vector<8x32xbf16>, vector<32x128xbf16>, vector<8x128xf32> -> vector<8x128xf32>
    %48 = arith.addf %44, %47 : vector<8x128xf32>
    %49 = vector.extract_strided_slice %48 {offsets = [0, 0], sizes = [8, 32], strides = [1, 1]} : vector<8x128xf32> to vector<8x32xf32>
    %50 = arith.negf %49 : vector<8x32xf32>
    %51 = math.exp %50 : vector<8x32xf32>
    %cst_23 = arith.constant 1.000000e+00 : f32
    %52 = vector.broadcast %cst_23 : f32 to vector<8x32xf32>
    %53 = arith.addf %52, %51 : vector<8x32xf32>
    %54 = arith.divf %52, %53 : vector<8x32xf32>
    %55 = vector.extract_strided_slice %48 {offsets = [0, 32], sizes = [8, 32], strides = [1, 1]} : vector<8x128xf32> to vector<8x32xf32>
    %56 = arith.negf %55 : vector<8x32xf32>
    %57 = math.exp %56 : vector<8x32xf32>
    %cst_24 = arith.constant 1.000000e+00 : f32
    %58 = vector.broadcast %cst_24 : f32 to vector<8x32xf32>
    %59 = arith.addf %58, %57 : vector<8x32xf32>
    %60 = arith.divf %58, %59 : vector<8x32xf32>
    %61 = vector.extract_strided_slice %48 {offsets = [0, 64], sizes = [8, 32], strides = [1, 1]} : vector<8x128xf32> to vector<8x32xf32>
    %62 = math.tanh %61 : vector<8x32xf32>
    %63 = vector.extract_strided_slice %48 {offsets = [0, 96], sizes = [8, 32], strides = [1, 1]} : vector<8x128xf32> to vector<8x32xf32>
    %64 = arith.negf %63 : vector<8x32xf32>
    %65 = math.exp %64 : vector<8x32xf32>
    %cst_25 = arith.constant 1.000000e+00 : f32
    %66 = vector.broadcast %cst_25 : f32 to vector<8x32xf32>
    %67 = arith.addf %66, %65 : vector<8x32xf32>
    %68 = arith.divf %66, %67 : vector<8x32xf32>
    %c0_26 = arith.constant 0 : index
    %c0_27 = arith.constant 0 : index
    %69 = vector.load %arg6[%c0_26, %c0_27] : memref<8x32xf32, #tpu.memory_space<vmem>>, vector<8x32xf32>
    %70 = arith.mulf %60, %69 : vector<8x32xf32>
    %71 = arith.mulf %54, %62 : vector<8x32xf32>
    %72 = arith.addf %70, %71 : vector<8x32xf32>
    %73 = math.tanh %72 : vector<8x32xf32>
    %74 = arith.mulf %68, %73 : vector<8x32xf32>
    %c0_28 = arith.constant 0 : index
    %c0_29 = arith.constant 0 : index
    %75 = vector.load %arg6[%c0_28, %c0_29] : memref<8x32xf32, #tpu.memory_space<vmem>>, vector<8x32xf32>
    tpu.vector_store %arg6[%c0_28, %c0_29], %72 {strides = array<i32>} : memref<8x32xf32, #tpu.memory_space<vmem>>, vector<8x32xf32>,
    %c0_30 = arith.constant 0 : index
    %c0_31 = arith.constant 0 : index
    %76 = vector.load %arg5[%c0_30, %c0_31] : memref<8x32xf32, #tpu.memory_space<vmem>>, vector<8x32xf32>
    tpu.vector_store %arg5[%c0_30, %c0_31], %74 {strides = array<i32>} : memref<8x32xf32, #tpu.memory_space<vmem>>, vector<8x32xf32>,
    %77 = vector.shape_cast %74 : vector<8x32xf32> to vector<8x1x32xf32>
    %c0_32 = arith.constant 0 : index
    %78 = arith.index_cast %c1_i32 : i32 to index
    %c0_33 = arith.constant 0 : index
    %79 = vector.load %arg4[%c0_32, %78, %c0_33] : memref<8x8x32xf32, #tpu.memory_space<vmem>>, vector<8x1x32xf32>
    tpu.vector_store %arg4[%c0_32, %78, %c0_33], %77 {strides = array<i32>} : memref<8x8x32xf32, #tpu.memory_space<vmem>>, vector<8x1x32xf32>,
    %c2_i32 = arith.constant 2 : i32
    %80 = arith.index_cast %c2_i32 : i32 to index
    %c0_34 = arith.constant 0 : index
    %c0_35 = arith.constant 0 : index
    %81 = vector.load %arg2[%80, %c0_34, %c0_35] : memref<8x8x128xf32, #tpu.memory_space<vmem>>, vector<1x8x128xf32>
    %82 = vector.shape_cast %81 : vector<1x8x128xf32> to vector<8x128xf32>
    %c0_36 = arith.constant 0 : index
    %c0_37 = arith.constant 0 : index
    %83 = vector.load %arg5[%c0_36, %c0_37] : memref<8x32xf32, #tpu.memory_space<vmem>>, vector<8x32xf32>
    %84 = arith.truncf %83 : vector<8x32xf32> to vector<8x32xbf16>
    %cst_38 = arith.constant dense<0.000000e+00> : vector<8x128xf32>
    %85 = tpu.matmul %84, %3, %cst_38 {dimension_numbers = #tpu.dot_dimension_numbers<[1], [0], [0], [1], [0, 0, 1, 1], [], []>} : vector<8x32xbf16>, vector<32x128xbf16>, vector<8x128xf32> -> vector<8x128xf32>
    %86 = arith.addf %82, %85 : vector<8x128xf32>
    %87 = vector.extract_strided_slice %86 {offsets = [0, 0], sizes = [8, 32], strides = [1, 1]} : vector<8x128xf32> to vector<8x32xf32>
    %88 = arith.negf %87 : vector<8x32xf32>
    %89 = math.exp %88 : vector<8x32xf32>
    %cst_39 = arith.constant 1.000000e+00 : f32
    %90 = vector.broadcast %cst_39 : f32 to vector<8x32xf32>
    %91 = arith.addf %90, %89 : vector<8x32xf32>
    %92 = arith.divf %90, %91 : vector<8x32xf32>
    %93 = vector.extract_strided_slice %86 {offsets = [0, 32], sizes = [8, 32], strides = [1, 1]} : vector<8x128xf32> to vector<8x32xf32>
    %94 = arith.negf %93 : vector<8x32xf32>
    %95 = math.exp %94 : vector<8x32xf32>
    %cst_40 = arith.constant 1.000000e+00 : f32
    %96 = vector.broadcast %cst_40 : f32 to vector<8x32xf32>
    %97 = arith.addf %96, %95 : vector<8x32xf32>
    %98 = arith.divf %96, %97 : vector<8x32xf32>
    %99 = vector.extract_strided_slice %86 {offsets = [0, 64], sizes = [8, 32], strides = [1, 1]} : vector<8x128xf32> to vector<8x32xf32>
    %100 = math.tanh %99 : vector<8x32xf32>
    %101 = vector.extract_strided_slice %86 {offsets = [0, 96], sizes = [8, 32], strides = [1, 1]} : vector<8x128xf32> to vector<8x32xf32>
    %102 = arith.negf %101 : vector<8x32xf32>
    %103 = math.exp %102 : vector<8x32xf32>
    %cst_41 = arith.constant 1.000000e+00 : f32
    %104 = vector.broadcast %cst_41 : f32 to vector<8x32xf32>
    %105 = arith.addf %104, %103 : vector<8x32xf32>
    %106 = arith.divf %104, %105 : vector<8x32xf32>
    %c0_42 = arith.constant 0 : index
    %c0_43 = arith.constant 0 : index
    %107 = vector.load %arg6[%c0_42, %c0_43] : memref<8x32xf32, #tpu.memory_space<vmem>>, vector<8x32xf32>
    %108 = arith.mulf %98, %107 : vector<8x32xf32>
    %109 = arith.mulf %92, %100 : vector<8x32xf32>
    %110 = arith.addf %108, %109 : vector<8x32xf32>
    %111 = math.tanh %110 : vector<8x32xf32>
    %112 = arith.mulf %106, %111 : vector<8x32xf32>
    %c0_44 = arith.constant 0 : index
    %c0_45 = arith.constant 0 : index
    %113 = vector.load %arg6[%c0_44, %c0_45] : memref<8x32xf32, #tpu.memory_space<vmem>>, vector<8x32xf32>
    tpu.vector_store %arg6[%c0_44, %c0_45], %110 {strides = array<i32>} : memref<8x32xf32, #tpu.memory_space<vmem>>, vector<8x32xf32>,
    %c0_46 = arith.constant 0 : index
    %c0_47 = arith.constant 0 : index
    %114 = vector.load %arg5[%c0_46, %c0_47] : memref<8x32xf32, #tpu.memory_space<vmem>>, vector<8x32xf32>
    tpu.vector_store %arg5[%c0_46, %c0_47], %112 {strides = array<i32>} : memref<8x32xf32, #tpu.memory_space<vmem>>, vector<8x32xf32>,
    %115 = vector.shape_cast %112 : vector<8x32xf32> to vector<8x1x32xf32>
    %c0_48 = arith.constant 0 : index
    %116 = arith.index_cast %c2_i32 : i32 to index
    %c0_49 = arith.constant 0 : index
    %117 = vector.load %arg4[%c0_48, %116, %c0_49] : memref<8x8x32xf32, #tpu.memory_space<vmem>>, vector<8x1x32xf32>
    tpu.vector_store %arg4[%c0_48, %116, %c0_49], %115 {strides = array<i32>} : memref<8x8x32xf32, #tpu.memory_space<vmem>>, vector<8x1x32xf32>,
    %c3_i32 = arith.constant 3 : i32
    %118 = arith.index_cast %c3_i32 : i32 to index
    %c0_50 = arith.constant 0 : index
    %c0_51 = arith.constant 0 : index
    %119 = vector.load %arg2[%118, %c0_50, %c0_51] : memref<8x8x128xf32, #tpu.memory_space<vmem>>, vector<1x8x128xf32>
    %120 = vector.shape_cast %119 : vector<1x8x128xf32> to vector<8x128xf32>
    %c0_52 = arith.constant 0 : index
    %c0_53 = arith.constant 0 : index
    %121 = vector.load %arg5[%c0_52, %c0_53] : memref<8x32xf32, #tpu.memory_space<vmem>>, vector<8x32xf32>
    %122 = arith.truncf %121 : vector<8x32xf32> to vector<8x32xbf16>
    %cst_54 = arith.constant dense<0.000000e+00> : vector<8x128xf32>
    %123 = tpu.matmul %122, %3, %cst_54 {dimension_numbers = #tpu.dot_dimension_numbers<[1], [0], [0], [1], [0, 0, 1, 1], [], []>} : vector<8x32xbf16>, vector<32x128xbf16>, vector<8x128xf32> -> vector<8x128xf32>
    %124 = arith.addf %120, %123 : vector<8x128xf32>
    %125 = vector.extract_strided_slice %124 {offsets = [0, 0], sizes = [8, 32], strides = [1, 1]} : vector<8x128xf32> to vector<8x32xf32>
    %126 = arith.negf %125 : vector<8x32xf32>
    %127 = math.exp %126 : vector<8x32xf32>
    %cst_55 = arith.constant 1.000000e+00 : f32
    %128 = vector.broadcast %cst_55 : f32 to vector<8x32xf32>
    %129 = arith.addf %128, %127 : vector<8x32xf32>
    %130 = arith.divf %128, %129 : vector<8x32xf32>
    %131 = vector.extract_strided_slice %124 {offsets = [0, 32], sizes = [8, 32], strides = [1, 1]} : vector<8x128xf32> to vector<8x32xf32>
    %132 = arith.negf %131 : vector<8x32xf32>
    %133 = math.exp %132 : vector<8x32xf32>
    %cst_56 = arith.constant 1.000000e+00 : f32
    %134 = vector.broadcast %cst_56 : f32 to vector<8x32xf32>
    %135 = arith.addf %134, %133 : vector<8x32xf32>
    %136 = arith.divf %134, %135 : vector<8x32xf32>
    %137 = vector.extract_strided_slice %124 {offsets = [0, 64], sizes = [8, 32], strides = [1, 1]} : vector<8x128xf32> to vector<8x32xf32>
    %138 = math.tanh %137 : vector<8x32xf32>
    %139 = vector.extract_strided_slice %124 {offsets = [0, 96], sizes = [8, 32], strides = [1, 1]} : vector<8x128xf32> to vector<8x32xf32>
    %140 = arith.negf %139 : vector<8x32xf32>
    %141 = math.exp %140 : vector<8x32xf32>
    %cst_57 = arith.constant 1.000000e+00 : f32
    %142 = vector.broadcast %cst_57 : f32 to vector<8x32xf32>
    %143 = arith.addf %142, %141 : vector<8x32xf32>
    %144 = arith.divf %142, %143 : vector<8x32xf32>
    %c0_58 = arith.constant 0 : index
    %c0_59 = arith.constant 0 : index
    %145 = vector.load %arg6[%c0_58, %c0_59] : memref<8x32xf32, #tpu.memory_space<vmem>>, vector<8x32xf32>
    %146 = arith.mulf %136, %145 : vector<8x32xf32>
    %147 = arith.mulf %130, %138 : vector<8x32xf32>
    %148 = arith.addf %146, %147 : vector<8x32xf32>
    %149 = math.tanh %148 : vector<8x32xf32>
    %150 = arith.mulf %144, %149 : vector<8x32xf32>
    %c0_60 = arith.constant 0 : index
    %c0_61 = arith.constant 0 : index
    %151 = vector.load %arg6[%c0_60, %c0_61] : memref<8x32xf32, #tpu.memory_space<vmem>>, vector<8x32xf32>
    tpu.vector_store %arg6[%c0_60, %c0_61], %148 {strides = array<i32>} : memref<8x32xf32, #tpu.memory_space<vmem>>, vector<8x32xf32>,
    %c0_62 = arith.constant 0 : index
    %c0_63 = arith.constant 0 : index
    %152 = vector.load %arg5[%c0_62, %c0_63] : memref<8x32xf32, #tpu.memory_space<vmem>>, vector<8x32xf32>
    tpu.vector_store %arg5[%c0_62, %c0_63], %150 {strides = array<i32>} : memref<8x32xf32, #tpu.memory_space<vmem>>, vector<8x32xf32>,
    %153 = vector.shape_cast %150 : vector<8x32xf32> to vector<8x1x32xf32>
    %c0_64 = arith.constant 0 : index
    %154 = arith.index_cast %c3_i32 : i32 to index
    %c0_65 = arith.constant 0 : index
    %155 = vector.load %arg4[%c0_64, %154, %c0_65] : memref<8x8x32xf32, #tpu.memory_space<vmem>>, vector<8x1x32xf32>
    tpu.vector_store %arg4[%c0_64, %154, %c0_65], %153 {strides = array<i32>} : memref<8x8x32xf32, #tpu.memory_space<vmem>>, vector<8x1x32xf32>,
    %c4_i32 = arith.constant 4 : i32
    %156 = arith.index_cast %c4_i32 : i32 to index
    %c0_66 = arith.constant 0 : index
    %c0_67 = arith.constant 0 : index
    %157 = vector.load %arg2[%156, %c0_66, %c0_67] : memref<8x8x128xf32, #tpu.memory_space<vmem>>, vector<1x8x128xf32>
    %158 = vector.shape_cast %157 : vector<1x8x128xf32> to vector<8x128xf32>
    %c0_68 = arith.constant 0 : index
    %c0_69 = arith.constant 0 : index
    %159 = vector.load %arg5[%c0_68, %c0_69] : memref<8x32xf32, #tpu.memory_space<vmem>>, vector<8x32xf32>
    %160 = arith.truncf %159 : vector<8x32xf32> to vector<8x32xbf16>
    %cst_70 = arith.constant dense<0.000000e+00> : vector<8x128xf32>
    %161 = tpu.matmul %160, %3, %cst_70 {dimension_numbers = #tpu.dot_dimension_numbers<[1], [0], [0], [1], [0, 0, 1, 1], [], []>} : vector<8x32xbf16>, vector<32x128xbf16>, vector<8x128xf32> -> vector<8x128xf32>
    %162 = arith.addf %158, %161 : vector<8x128xf32>
    %163 = vector.extract_strided_slice %162 {offsets = [0, 0], sizes = [8, 32], strides = [1, 1]} : vector<8x128xf32> to vector<8x32xf32>
    %164 = arith.negf %163 : vector<8x32xf32>
    %165 = math.exp %164 : vector<8x32xf32>
    %cst_71 = arith.constant 1.000000e+00 : f32
    %166 = vector.broadcast %cst_71 : f32 to vector<8x32xf32>
    %167 = arith.addf %166, %165 : vector<8x32xf32>
    %168 = arith.divf %166, %167 : vector<8x32xf32>
    %169 = vector.extract_strided_slice %162 {offsets = [0, 32], sizes = [8, 32], strides = [1, 1]} : vector<8x128xf32> to vector<8x32xf32>
    %170 = arith.negf %169 : vector<8x32xf32>
    %171 = math.exp %170 : vector<8x32xf32>
    %cst_72 = arith.constant 1.000000e+00 : f32
    %172 = vector.broadcast %cst_72 : f32 to vector<8x32xf32>
    %173 = arith.addf %172, %171 : vector<8x32xf32>
    %174 = arith.divf %172, %173 : vector<8x32xf32>
    %175 = vector.extract_strided_slice %162 {offsets = [0, 64], sizes = [8, 32], strides = [1, 1]} : vector<8x128xf32> to vector<8x32xf32>
    %176 = math.tanh %175 : vector<8x32xf32>
    %177 = vector.extract_strided_slice %162 {offsets = [0, 96], sizes = [8, 32], strides = [1, 1]} : vector<8x128xf32> to vector<8x32xf32>
    %178 = arith.negf %177 : vector<8x32xf32>
    %179 = math.exp %178 : vector<8x32xf32>
    %cst_73 = arith.constant 1.000000e+00 : f32
    %180 = vector.broadcast %cst_73 : f32 to vector<8x32xf32>
    %181 = arith.addf %180, %179 : vector<8x32xf32>
    %182 = arith.divf %180, %181 : vector<8x32xf32>
    %c0_74 = arith.constant 0 : index
    %c0_75 = arith.constant 0 : index
    %183 = vector.load %arg6[%c0_74, %c0_75] : memref<8x32xf32, #tpu.memory_space<vmem>>, vector<8x32xf32>
    %184 = arith.mulf %174, %183 : vector<8x32xf32>
    %185 = arith.mulf %168, %176 : vector<8x32xf32>
    %186 = arith.addf %184, %185 : vector<8x32xf32>
    %187 = math.tanh %186 : vector<8x32xf32>
    %188 = arith.mulf %182, %187 : vector<8x32xf32>
    %c0_76 = arith.constant 0 : index
    %c0_77 = arith.constant 0 : index
    %189 = vector.load %arg6[%c0_76, %c0_77] : memref<8x32xf32, #tpu.memory_space<vmem>>, vector<8x32xf32>
    tpu.vector_store %arg6[%c0_76, %c0_77], %186 {strides = array<i32>} : memref<8x32xf32, #tpu.memory_space<vmem>>, vector<8x32xf32>,
    %c0_78 = arith.constant 0 : index
    %c0_79 = arith.constant 0 : index
    %190 = vector.load %arg5[%c0_78, %c0_79] : memref<8x32xf32, #tpu.memory_space<vmem>>, vector<8x32xf32>
    tpu.vector_store %arg5[%c0_78, %c0_79], %188 {strides = array<i32>} : memref<8x32xf32, #tpu.memory_space<vmem>>, vector<8x32xf32>,
    %191 = vector.shape_cast %188 : vector<8x32xf32> to vector<8x1x32xf32>
    %c0_80 = arith.constant 0 : index
    %192 = arith.index_cast %c4_i32 : i32 to index
    %c0_81 = arith.constant 0 : index
    %193 = vector.load %arg4[%c0_80, %192, %c0_81] : memref<8x8x32xf32, #tpu.memory_space<vmem>>, vector<8x1x32xf32>
    tpu.vector_store %arg4[%c0_80, %192, %c0_81], %191 {strides = array<i32>} : memref<8x8x32xf32, #tpu.memory_space<vmem>>, vector<8x1x32xf32>,
    %c5_i32 = arith.constant 5 : i32
    %194 = arith.index_cast %c5_i32 : i32 to index
    %c0_82 = arith.constant 0 : index
    %c0_83 = arith.constant 0 : index
    %195 = vector.load %arg2[%194, %c0_82, %c0_83] : memref<8x8x128xf32, #tpu.memory_space<vmem>>, vector<1x8x128xf32>
    %196 = vector.shape_cast %195 : vector<1x8x128xf32> to vector<8x128xf32>
    %c0_84 = arith.constant 0 : index
    %c0_85 = arith.constant 0 : index
    %197 = vector.load %arg5[%c0_84, %c0_85] : memref<8x32xf32, #tpu.memory_space<vmem>>, vector<8x32xf32>
    %198 = arith.truncf %197 : vector<8x32xf32> to vector<8x32xbf16>
    %cst_86 = arith.constant dense<0.000000e+00> : vector<8x128xf32>
    %199 = tpu.matmul %198, %3, %cst_86 {dimension_numbers = #tpu.dot_dimension_numbers<[1], [0], [0], [1], [0, 0, 1, 1], [], []>} : vector<8x32xbf16>, vector<32x128xbf16>, vector<8x128xf32> -> vector<8x128xf32>
    %200 = arith.addf %196, %199 : vector<8x128xf32>
    %201 = vector.extract_strided_slice %200 {offsets = [0, 0], sizes = [8, 32], strides = [1, 1]} : vector<8x128xf32> to vector<8x32xf32>
    %202 = arith.negf %201 : vector<8x32xf32>
    %203 = math.exp %202 : vector<8x32xf32>
    %cst_87 = arith.constant 1.000000e+00 : f32
    %204 = vector.broadcast %cst_87 : f32 to vector<8x32xf32>
    %205 = arith.addf %204, %203 : vector<8x32xf32>
    %206 = arith.divf %204, %205 : vector<8x32xf32>
    %207 = vector.extract_strided_slice %200 {offsets = [0, 32], sizes = [8, 32], strides = [1, 1]} : vector<8x128xf32> to vector<8x32xf32>
    %208 = arith.negf %207 : vector<8x32xf32>
    %209 = math.exp %208 : vector<8x32xf32>
    %cst_88 = arith.constant 1.000000e+00 : f32
    %210 = vector.broadcast %cst_88 : f32 to vector<8x32xf32>
    %211 = arith.addf %210, %209 : vector<8x32xf32>
    %212 = arith.divf %210, %211 : vector<8x32xf32>
    %213 = vector.extract_strided_slice %200 {offsets = [0, 64], sizes = [8, 32], strides = [1, 1]} : vector<8x128xf32> to vector<8x32xf32>
    %214 = math.tanh %213 : vector<8x32xf32>
    %215 = vector.extract_strided_slice %200 {offsets = [0, 96], sizes = [8, 32], strides = [1, 1]} : vector<8x128xf32> to vector<8x32xf32>
    %216 = arith.negf %215 : vector<8x32xf32>
    %217 = math.exp %216 : vector<8x32xf32>
    %cst_89 = arith.constant 1.000000e+00 : f32
    %218 = vector.broadcast %cst_89 : f32 to vector<8x32xf32>
    %219 = arith.addf %218, %217 : vector<8x32xf32>
    %220 = arith.divf %218, %219 : vector<8x32xf32>
    %c0_90 = arith.constant 0 : index
    %c0_91 = arith.constant 0 : index
    %221 = vector.load %arg6[%c0_90, %c0_91] : memref<8x32xf32, #tpu.memory_space<vmem>>, vector<8x32xf32>
    %222 = arith.mulf %212, %221 : vector<8x32xf32>
    %223 = arith.mulf %206, %214 : vector<8x32xf32>
    %224 = arith.addf %222, %223 : vector<8x32xf32>
    %225 = math.tanh %224 : vector<8x32xf32>
    %226 = arith.mulf %220, %225 : vector<8x32xf32>
    %c0_92 = arith.constant 0 : index
    %c0_93 = arith.constant 0 : index
    %227 = vector.load %arg6[%c0_92, %c0_93] : memref<8x32xf32, #tpu.memory_space<vmem>>, vector<8x32xf32>
    tpu.vector_store %arg6[%c0_92, %c0_93], %224 {strides = array<i32>} : memref<8x32xf32, #tpu.memory_space<vmem>>, vector<8x32xf32>,
    %c0_94 = arith.constant 0 : index
    %c0_95 = arith.constant 0 : index
    %228 = vector.load %arg5[%c0_94, %c0_95] : memref<8x32xf32, #tpu.memory_space<vmem>>, vector<8x32xf32>
    tpu.vector_store %arg5[%c0_94, %c0_95], %226 {strides = array<i32>} : memref<8x32xf32, #tpu.memory_space<vmem>>, vector<8x32xf32>,
    %229 = vector.shape_cast %226 : vector<8x32xf32> to vector<8x1x32xf32>
    %c0_96 = arith.constant 0 : index
    %230 = arith.index_cast %c5_i32 : i32 to index
    %c0_97 = arith.constant 0 : index
    %231 = vector.load %arg4[%c0_96, %230, %c0_97] : memref<8x8x32xf32, #tpu.memory_space<vmem>>, vector<8x1x32xf32>
    tpu.vector_store %arg4[%c0_96, %230, %c0_97], %229 {strides = array<i32>} : memref<8x8x32xf32, #tpu.memory_space<vmem>>, vector<8x1x32xf32>,
    %c6_i32 = arith.constant 6 : i32
    %232 = arith.index_cast %c6_i32 : i32 to index
    %c0_98 = arith.constant 0 : index
    %c0_99 = arith.constant 0 : index
    %233 = vector.load %arg2[%232, %c0_98, %c0_99] : memref<8x8x128xf32, #tpu.memory_space<vmem>>, vector<1x8x128xf32>
    %234 = vector.shape_cast %233 : vector<1x8x128xf32> to vector<8x128xf32>
    %c0_100 = arith.constant 0 : index
    %c0_101 = arith.constant 0 : index
    %235 = vector.load %arg5[%c0_100, %c0_101] : memref<8x32xf32, #tpu.memory_space<vmem>>, vector<8x32xf32>
    %236 = arith.truncf %235 : vector<8x32xf32> to vector<8x32xbf16>
    %cst_102 = arith.constant dense<0.000000e+00> : vector<8x128xf32>
    %237 = tpu.matmul %236, %3, %cst_102 {dimension_numbers = #tpu.dot_dimension_numbers<[1], [0], [0], [1], [0, 0, 1, 1], [], []>} : vector<8x32xbf16>, vector<32x128xbf16>, vector<8x128xf32> -> vector<8x128xf32>
    %238 = arith.addf %234, %237 : vector<8x128xf32>
    %239 = vector.extract_strided_slice %238 {offsets = [0, 0], sizes = [8, 32], strides = [1, 1]} : vector<8x128xf32> to vector<8x32xf32>
    %240 = arith.negf %239 : vector<8x32xf32>
    %241 = math.exp %240 : vector<8x32xf32>
    %cst_103 = arith.constant 1.000000e+00 : f32
    %242 = vector.broadcast %cst_103 : f32 to vector<8x32xf32>
    %243 = arith.addf %242, %241 : vector<8x32xf32>
    %244 = arith.divf %242, %243 : vector<8x32xf32>
    %245 = vector.extract_strided_slice %238 {offsets = [0, 32], sizes = [8, 32], strides = [1, 1]} : vector<8x128xf32> to vector<8x32xf32>
    %246 = arith.negf %245 : vector<8x32xf32>
    %247 = math.exp %246 : vector<8x32xf32>
    %cst_104 = arith.constant 1.000000e+00 : f32
    %248 = vector.broadcast %cst_104 : f32 to vector<8x32xf32>
    %249 = arith.addf %248, %247 : vector<8x32xf32>
    %250 = arith.divf %248, %249 : vector<8x32xf32>
    %251 = vector.extract_strided_slice %238 {offsets = [0, 64], sizes = [8, 32], strides = [1, 1]} : vector<8x128xf32> to vector<8x32xf32>
    %252 = math.tanh %251 : vector<8x32xf32>
    %253 = vector.extract_strided_slice %238 {offsets = [0, 96], sizes = [8, 32], strides = [1, 1]} : vector<8x128xf32> to vector<8x32xf32>
    %254 = arith.negf %253 : vector<8x32xf32>
    %255 = math.exp %254 : vector<8x32xf32>
    %cst_105 = arith.constant 1.000000e+00 : f32
    %256 = vector.broadcast %cst_105 : f32 to vector<8x32xf32>
    %257 = arith.addf %256, %255 : vector<8x32xf32>
    %258 = arith.divf %256, %257 : vector<8x32xf32>
    %c0_106 = arith.constant 0 : index
    %c0_107 = arith.constant 0 : index
    %259 = vector.load %arg6[%c0_106, %c0_107] : memref<8x32xf32, #tpu.memory_space<vmem>>, vector<8x32xf32>
    %260 = arith.mulf %250, %259 : vector<8x32xf32>
    %261 = arith.mulf %244, %252 : vector<8x32xf32>
    %262 = arith.addf %260, %261 : vector<8x32xf32>
    %263 = math.tanh %262 : vector<8x32xf32>
    %264 = arith.mulf %258, %263 : vector<8x32xf32>
    %c0_108 = arith.constant 0 : index
    %c0_109 = arith.constant 0 : index
    %265 = vector.load %arg6[%c0_108, %c0_109] : memref<8x32xf32, #tpu.memory_space<vmem>>, vector<8x32xf32>
    tpu.vector_store %arg6[%c0_108, %c0_109], %262 {strides = array<i32>} : memref<8x32xf32, #tpu.memory_space<vmem>>, vector<8x32xf32>,
    %c0_110 = arith.constant 0 : index
    %c0_111 = arith.constant 0 : index
    %266 = vector.load %arg5[%c0_110, %c0_111] : memref<8x32xf32, #tpu.memory_space<vmem>>, vector<8x32xf32>
    tpu.vector_store %arg5[%c0_110, %c0_111], %264 {strides = array<i32>} : memref<8x32xf32, #tpu.memory_space<vmem>>, vector<8x32xf32>,
    %267 = vector.shape_cast %264 : vector<8x32xf32> to vector<8x1x32xf32>
    %c0_112 = arith.constant 0 : index
    %268 = arith.index_cast %c6_i32 : i32 to index
    %c0_113 = arith.constant 0 : index
    %269 = vector.load %arg4[%c0_112, %268, %c0_113] : memref<8x8x32xf32, #tpu.memory_space<vmem>>, vector<8x1x32xf32>
    tpu.vector_store %arg4[%c0_112, %268, %c0_113], %267 {strides = array<i32>} : memref<8x8x32xf32, #tpu.memory_space<vmem>>, vector<8x1x32xf32>,
    %c7_i32 = arith.constant 7 : i32
    %270 = arith.index_cast %c7_i32 : i32 to index
    %c0_114 = arith.constant 0 : index
    %c0_115 = arith.constant 0 : index
    %271 = vector.load %arg2[%270, %c0_114, %c0_115] : memref<8x8x128xf32, #tpu.memory_space<vmem>>, vector<1x8x128xf32>
    %272 = vector.shape_cast %271 : vector<1x8x128xf32> to vector<8x128xf32>
    %c0_116 = arith.constant 0 : index
    %c0_117 = arith.constant 0 : index
    %273 = vector.load %arg5[%c0_116, %c0_117] : memref<8x32xf32, #tpu.memory_space<vmem>>, vector<8x32xf32>
    %274 = arith.truncf %273 : vector<8x32xf32> to vector<8x32xbf16>
    %cst_118 = arith.constant dense<0.000000e+00> : vector<8x128xf32>
    %275 = tpu.matmul %274, %3, %cst_118 {dimension_numbers = #tpu.dot_dimension_numbers<[1], [0], [0], [1], [0, 0, 1, 1], [], []>} : vector<8x32xbf16>, vector<32x128xbf16>, vector<8x128xf32> -> vector<8x128xf32>
    %276 = arith.addf %272, %275 : vector<8x128xf32>
    %277 = vector.extract_strided_slice %276 {offsets = [0, 0], sizes = [8, 32], strides = [1, 1]} : vector<8x128xf32> to vector<8x32xf32>
    %278 = arith.negf %277 : vector<8x32xf32>
    %279 = math.exp %278 : vector<8x32xf32>
    %cst_119 = arith.constant 1.000000e+00 : f32
    %280 = vector.broadcast %cst_119 : f32 to vector<8x32xf32>
    %281 = arith.addf %280, %279 : vector<8x32xf32>
    %282 = arith.divf %280, %281 : vector<8x32xf32>
    %283 = vector.extract_strided_slice %276 {offsets = [0, 32], sizes = [8, 32], strides = [1, 1]} : vector<8x128xf32> to vector<8x32xf32>
    %284 = arith.negf %283 : vector<8x32xf32>
    %285 = math.exp %284 : vector<8x32xf32>
    %cst_120 = arith.constant 1.000000e+00 : f32
    %286 = vector.broadcast %cst_120 : f32 to vector<8x32xf32>
    %287 = arith.addf %286, %285 : vector<8x32xf32>
    %288 = arith.divf %286, %287 : vector<8x32xf32>
    %289 = vector.extract_strided_slice %276 {offsets = [0, 64], sizes = [8, 32], strides = [1, 1]} : vector<8x128xf32> to vector<8x32xf32>
    %290 = math.tanh %289 : vector<8x32xf32>
    %291 = vector.extract_strided_slice %276 {offsets = [0, 96], sizes = [8, 32], strides = [1, 1]} : vector<8x128xf32> to vector<8x32xf32>
    %292 = arith.negf %291 : vector<8x32xf32>
    %293 = math.exp %292 : vector<8x32xf32>
    %cst_121 = arith.constant 1.000000e+00 : f32
    %294 = vector.broadcast %cst_121 : f32 to vector<8x32xf32>
    %295 = arith.addf %294, %293 : vector<8x32xf32>
    %296 = arith.divf %294, %295 : vector<8x32xf32>
    %c0_122 = arith.constant 0 : index
    %c0_123 = arith.constant 0 : index
    %297 = vector.load %arg6[%c0_122, %c0_123] : memref<8x32xf32, #tpu.memory_space<vmem>>, vector<8x32xf32>
    %298 = arith.mulf %288, %297 : vector<8x32xf32>
    %299 = arith.mulf %282, %290 : vector<8x32xf32>
    %300 = arith.addf %298, %299 : vector<8x32xf32>
    %301 = math.tanh %300 : vector<8x32xf32>
    %302 = arith.mulf %296, %301 : vector<8x32xf32>
    %c0_124 = arith.constant 0 : index
    %c0_125 = arith.constant 0 : index
    %303 = vector.load %arg6[%c0_124, %c0_125] : memref<8x32xf32, #tpu.memory_space<vmem>>, vector<8x32xf32>
    tpu.vector_store %arg6[%c0_124, %c0_125], %300 {strides = array<i32>} : memref<8x32xf32, #tpu.memory_space<vmem>>, vector<8x32xf32>,
    %c0_126 = arith.constant 0 : index
    %c0_127 = arith.constant 0 : index
    %304 = vector.load %arg5[%c0_126, %c0_127] : memref<8x32xf32, #tpu.memory_space<vmem>>, vector<8x32xf32>
    tpu.vector_store %arg5[%c0_126, %c0_127], %302 {strides = array<i32>} : memref<8x32xf32, #tpu.memory_space<vmem>>, vector<8x32xf32>,
    %305 = vector.shape_cast %302 : vector<8x32xf32> to vector<8x1x32xf32>
    %c0_128 = arith.constant 0 : index
    %306 = arith.index_cast %c7_i32 : i32 to index
    %c0_129 = arith.constant 0 : index
    %307 = vector.load %arg4[%c0_128, %306, %c0_129] : memref<8x8x32xf32, #tpu.memory_space<vmem>>, vector<8x1x32xf32>
    tpu.vector_store %arg4[%c0_128, %306, %c0_129], %305 {strides = array<i32>} : memref<8x8x32xf32, #tpu.memory_space<vmem>>, vector<8x1x32xf32>,
    %c8_i32 = arith.constant 8 : i32
    return
  }
  func.func @transform_0(%arg0: i32, %arg1: i32) -> (i32, i32, i32) {
    %c0_i32 = arith.constant 0 : i32
    %c0_i32_0 = arith.constant 0 : i32
    return %arg1, %arg0, %c0_i32 : i32, i32, i32
  }
  func.func @transform_1(%arg0: i32, %arg1: i32) -> (i32, i32) {
    %c0_i32 = arith.constant 0 : i32
    %c0_i32_0 = arith.constant 0 : i32
    %c0_i32_1 = arith.constant 0 : i32
    return %c0_i32, %c0_i32_0 : i32, i32
  }
  func.func @transform_2(%arg0: i32, %arg1: i32) -> (i32, i32, i32) {
    %c0_i32 = arith.constant 0 : i32
    %c0_i32_0 = arith.constant 0 : i32
    return %arg0, %arg1, %c0_i32 : i32, i32, i32
  }
  func.func @transform_3(%arg0: i32, %arg1: i32) -> (i32, i32) {
    %c0_i32 = arith.constant 0 : i32
    %c0_i32_0 = arith.constant 0 : i32
    return %arg0, %c0_i32 : i32, i32
  }
  func.func @transform_4(%arg0: i32, %arg1: i32) -> (i32, i32) {
    %c0_i32 = arith.constant 0 : i32
    %c0_i32_0 = arith.constant 0 : i32
    return %arg0, %c0_i32 : i32, i32
  }
}

</mosaic_0001>

<bundles_post_ra>
// kernel: naive_lstm_forward.1
= control target key start
LH: loop header
LB: loop body
LE: loop exit
PB: predicated region body
PF: predicated region fallthrough
CT: control target
= control target key end

     0   :  { %10 = vsyncpa [#allocation3], 0  ;;  %s3203_s0 = inlined_call_operand.vmem [shape: f32[16,8,128], index: 0, kind: input, shape index: {}]   ;;  %s3204_s1 = inlined_call_operand.vmem [shape: bf16[32,128], index: 1, kind: input, shape index: {}]   ;;  %s3205_s2 = inlined_call_operand.hbm [shape: f32[8,16,32], index: 2, kind: output, shape index: {0}]   ;;  %s3206_s3 = inlined_call_operand.hbm [shape: f32[8,32], index: 3, kind: output, shape index: {1}]   ;;  %s3207_s4 = inlined_call_operand.hbm [shape: f32[8,32], index: 4, kind: output, shape index: {2}]  }
   0x1   :  { %12 = vsyncpa [#allocation3 + $0x1], 0 }
   0x2   :  { %13 = vsyncpa [#allocation5], 0  ;;  %s2446_s15 = smov 0   ;;  %s2448_s16 = smov 0  }
   0x3   :  { %s2450_s17 = smov 0   ;;  %s2452_s18 = smov 0  }
   0x4   :  { %s2454_s19 = smov 0   ;;  %s2456_s20 = smov 0  }
   0x5 LB: > { %s1997_s21 = sadd.s32 4294967295, %s2406_s20   ;;  %s1998_s22 = sadd.s32 4294967294, %s2406_s20   ;;  %s2406_s20 = sphi %s2456_s20, %s19_s20   ;;  %s2402_s19 = sphi %s2454_s19, %s3215_s19   ;;  %s2398_s18 = sphi %s2452_s18, %s3214_s18   ;;  %s2394_s17 = sphi %s2450_s17, %s3213_s17   ;;  %s2390_s16 = sphi %s2448_s16, %s3212_s16   ;;  %s2386_s15 = sphi %s2446_s15, %s3211_s15  }
   0x6   : > { %s28_s23 = sadd.s32 1, %s2402_s19  ;;  %s89_s24 = sadd.s32 1, %s2394_s17 }
   0x7   : > { %p29_p0 = scmp.ge.s32.totalorder %s28_s23, 2  ;;  %p99_p1 = scmp.ne.s32.totalorder %s2394_s17, %s2390_s16 }
   0x8   : > { %p2482_p2 = scmp.eq.s32.totalorder %s1997_s21, 1  ;;  %p105_p3 = scmp.ne.s32.totalorder %s2390_s16, %s2386_s15 }
   0x9   : > { %s3217_s23 = smov (%p29_p0, %s28_s23), 0  ;;  %p106_p5 = scmp.eq.s32.totalorder %s1998_s22, 1 }
   0xa   : > { %p2492_p4 = por %p2482_p2, %p99_p1  ;;  %s85_s27 = ssub.s32 %s2402_s19, %s3217_s23 }
   0xb   : > { %p2001_p6 = scmp.ge.s32.totalorder %s2406_s20, 1  ;;  %p87_p7 = scmp.eq.s32.totalorder %s85_s27, 0 }
   0xc   : > { %p2499_p8 = por %p106_p5, %p105_p3  ;;  %p191_p9 = scmp.lt.s32.totalorder %s2406_s20, 3 }
   0xd   : > { %s2505_s29 = scalar_select %p87_p7, %s2394_s17, %s89_s24  }
   0xe   : > { %p192_p10 = pnand %p2001_p6, %p191_p9 }
   0xf   : > { %s213_s30 = sand.u32 (!%p192_p10), 1, %s2390_s16   ;;  %s2003_s5 = sshll.u32 (!%p192_p10), %s2398_s18, 3 }
  0x10   : > { %195 = sbr.rel (%p192_p10) target bundleno = 5789 (0x169d), region = 28  ;;  %s2002_s6 = sshll.u32 (!%p192_p10), %s213_s30, 6 }
  0x11   : > { %p221_p11 = scmp.lt.s32.totalorder (!%p192_p10), %s2003_s5, 15  ;;  %s2516_s11 = scalar_lea.vmem (!%p192_p10), [#allocation2], %s2002_s6 }
  0x12   : > { %p2005_p12 = scmp.ne.s32.totalorder (!%p192_p10), %s2398_s18, 0 }
  0x17   : > { %s3219_s5 = smov (!%p221_p11, %s2003_s5), 15  ;;  %234 = sbr.rel (%p2005_p12) target bundleno = 30 (0x1e), region = 32 }
  0x18   : > { %s2004_s7 = sshll.u32 %s3219_s5, 3  ;;  %vm235_vm0 = vcmask (!%p2005_p12), 261120   ;;  %v2408_v0 = vmov (!%p2005_p12), 0.0  }
  0x19   : > { %s2514_s10 = scalar_lea.vmem %s3203_s0, %s2004_s7  ;;  %236 = vst.msk [vmem:[#allocation4] sm:$0xff] (!%p2005_p12), %vm235_vm0, %v2408_v0  ;;  %237 = vst.msk [vmem:[#allocation6] sm:$0xff] (!%p2005_p12), %vm235_vm0, %v2408_v0 }
  0x1e PF: > { %v2522_v1 = vld [vmem:[%s3204_s1] sm:$0xff]   ;;  %v2409_v2 = vmov 0.0   ;;  %v2530_v3 = vld [vmem:[%s3204_s1 + $0x8] sm:$0xff]   ;;  %vm2410_vm1 = vmmov 0   ;;  %vm257_vm2 = vcmask 261120   ;;  %s2411_s22 = smov 64  }
  0x1f   : > { %2063 = vmatprep.subr.bf16.mxu0 %v2409_v2  ;;  %2071 = vmatprep.subr.bf16.mxu1 %v2409_v2  ;;  %v242_v6 = vld [vmem:[%s2514_s10] sm:$0xff]  ;;  %s2412_s24 = smov 32   ;;  %s2413_s27 = smov 96   ;;  %v2010_v32 = vld [vmem:[%s2514_s10 + $0x8] sm:$0xff]  ;;  %v2013_v57 = vld [vmem:[%s2514_s10 + $0x10] sm:$0xff]  ;;  %vm446_vm3 = vcmask 253952  }
  0x20   : > { %2064 = vmatpush3.bf16.msra.mxu0 %v2522_v1  ;;  %2067 = vmatprep.mubr.msk.bf16.mxu0 %vm2410_vm1, %v2409_v2  ;;  %v243_v4 = vld [vmem:[#allocation4] sm:$0xff]  ;;  %v309_v13 = vld [vmem:[#allocation6] sm:$0xff]  ;;  %s2415_s5 = smov [#allocation4]   ;;  %s2416_s7 = smov [#allocation6]  }
  0x21   : > { %2065 = vmatprep.subr.bf16.mxu0 %v2409_v2  ;;  %2072 = vmatpush3.bf16.msra.mxu1 %v2522_v1  ;;  %v244_v5 = vpack.c.bf16 %v243_v4, %v243_v4  ;;  %s1887_s6 = sshll.u32 %s2415_s5, 4  ;;  %s1900_s8 = sshll.u32 %s2416_s7, 4  ;;  %s1888_s6 = int_to_ptr.vmem [resolvable:$true] %s1887_s6  ;;  %s3082_s8 = int_to_ptr.vmem [resolvable:$true] %s1900_s8 }
  0x22   : > { %2073 = vmatprep.subr.bf16.mxu1 %v2409_v2  ;;  %2075 = vmatprep.mubr.msk.bf16.mxu1 %vm2410_vm1, %v2409_v2  ;;  %s2272_s9 = scalar_lea.vmem %s1888_s6, 128  ;;  %p2279_p3 = scmp.lt.s32.totalorder %s1888_s6, %s1888_s6 }
  0x23   : > { %p2273_p13 = scmp.ne.s32.totalorder %s1888_s6, %s2272_s9  ;;  %p2280_p5 = scmp.lt.s32.totalorder %s2272_s9, %s2272_s9 }
  0x24   : > { %2066 = vmatpush3.bf16.msra.mxu0 %v2530_v3 }
  0x25   : > { %2074 = vmatpush3.bf16.msra.mxu1 %v2530_v3  ;;  %2079 = vmatprep.subr.bf16.mxu0 %v2409_v2  ;;  %p2274_p0 = pnand %p2273_p13, %p2482_p2  ;;  %p2281_p6 = por %p2280_p5, %p2279_p3 }
  0x26   : > { %2087 = vmatprep.subr.bf16.mxu1 %v2409_v2 }
  0x27   : > { %2068 = vmatmul.mubr.msk.bf16.vlgmr.msra.gmra.mrb[0].mxu0 %vm257_vm2, %v244_v5  ;;  %p2275_p1 = pneg %p2274_p0 }
  0x28   : > { %2080 = vmatpush3.bf16.msra.mxu0 %v2522_v1  ;;  %2083 = vmatprep.mubr.msk.bf16.mxu0 %vm2410_vm1, %v2409_v2 }
  0x29   : > { %2081 = vmatprep.subr.bf16.mxu0 %v2409_v2  ;;  %p2282_p7 = pnand %p2281_p6, %p2275_p1 }
  0x2c   : > { %2082 = vmatpush3.bf16.msra.mxu0 %v2530_v3 }
  0x2d   : > { %2095 = vmatprep.subr.bf16.mxu0 %v2409_v2 }
  0xfa   : > { %v295_v7 = vpop.f32.mrb[0].mxu0 }
  0xfb   : > { %v301_v8 = vadd.f32 %v295_v7, %v242_v6  ;;  %v2069_v9 = vpop.f32.mrb[1].mxu0 }
  0xfc   : > { %v298_v10 = vpop.f32.mrb[2].mxu0 }
  0xfd   : > { %2208 = vtanh.f32 %v301_v8  ;;  %v2070_v11 = vpop.f32.mrb[3].mxu0  ;;  %v2009_v14 = vmul.f32 -1.442695, %v301_v8 }
  0xff   : > { %2210 = vpow2.f32 %v2009_v14 }
 0x107   : > { %v2209_v12 = vpop.eup %2208 }
 0x108   : > { %316 = vrot.lane.b32.xlu0 %v2209_v12, %s2411_s22 }
 0x109   : > { %v2211_v15 = vpop.eup %2210 }
 0x10a   : > { %v305_v16 = vadd.f32 1.0, %v2211_v15 }
 0x10c   : > { %311 = vrot.lane.b32.xlu0 %v309_v13, %s2412_s24  ;;  %2212 = vrcp.f32 %v305_v16 }
 0x116   : > { %v2213_v17 = vpop.eup %2212 }
 0x17a   : > { %v317_v18 = vpop.permute.xlu0 %316 }
 0x17b   : > { %v319_v19 = vmul.f32 %v2213_v17, %v317_v18 }
 0x17d   : > { %321 = vrot.lane.b32.xlu1 %v319_v19, %s2412_s24 }
 0x17e   : > { %v312_v20 = vpop.permute.xlu0 %311 }
 0x17f   : > { %v314_v21 = vmul.f32 %v2213_v17, %v312_v20 }
 0x1ef   : > { %v322_v22 = vpop.permute.xlu1 %321 }
 0x1f0   : > { %v324_v23 = vadd.f32 %v322_v22, %v314_v21  ;;  %v2016_v21 = vld [vmem:[%s2514_s10 + $0x18] sm:$0xff] }
 0x1f2   : > { %2214 = vtanh.f32 %v324_v23 }
 0x1fc   : > { %v2215_v24 = vpop.eup %2214 }
 0x1fd   : > { %327 = vrot.lane.b32.xlu1 %v2215_v24, %s2411_s22 }
 0x201   : > { %332 = vrot.lane.b32.xlu1 %v324_v23, %s2413_s27 }
 0x26f   : > { %v328_v25 = vpop.permute.xlu1 %327 }
 0x270   : > { %v2556_v26 = vmul.f32 %v2213_v17, %v328_v25 }
 0x272   : > { %337 = vrot.lane.b32.xlu0 %v2556_v26, %s2412_s24 }
 0x273   : > { %v333_v27 = vpop.permute.xlu1 %332 }
 0x274   : > { %335 = vst.msk [vmem:[#allocation6] sm:$0xff] %vm257_vm2, %v333_v27 }
 0x27b   : > { %v510_v28 = vld [vmem:[#allocation6] sm:$0xff] }
 0x27c   : > { %512 = vrot.lane.b32.xlu1 %v510_v28, %s2412_s24 }
 0x2e4   : > { %v338_v29 = vpop.permute.xlu0 %337 }
 0x2e5   : > { %340 = vst.msk [vmem:[#allocation4] sm:$0xff] %vm257_vm2, %v338_v29 }
 0x2ec   : > { %v457_v30 = vld [vmem:[#allocation4] sm:$0xff] }
 0x2ed   : > { %v458_v31 = vpack.c.bf16 %v457_v30, %v457_v30 }
 0x2ee   : > { %v513_v45 = vpop.permute.xlu1 %512 }
 0x2ef   : > { %2076 = vmatmul.mubr.msk.bf16.vlgmr.msra.gmra.mrb[0].mxu1 %vm257_vm2, %v458_v31 }
 0x2f0   : > { %2088 = vmatpush3.bf16.msra.mxu1 %v2522_v1  ;;  %2091 = vmatprep.mubr.msk.bf16.mxu1 %vm2410_vm1, %v2409_v2 }
 0x2f1   : > { %2089 = vmatprep.subr.bf16.mxu1 %v2409_v2 }
 0x2f4   : > { %2090 = vmatpush3.bf16.msra.mxu1 %v2530_v3 }
 0x2f5   : > { %2103 = vmatprep.subr.bf16.mxu1 %v2409_v2 }
 0x3c2   : > { %v496_v33 = vpop.f32.mrb[0].mxu1 }
 0x3c3   : > { %v502_v34 = vadd.f32 %v2010_v32, %v496_v33  ;;  %v2077_v35 = vpop.f32.mrb[1].mxu1 }
 0x3c4   : > { %v499_v36 = vpop.f32.mrb[2].mxu1 }
 0x3c5   : > { %2216 = vtanh.f32 %v502_v34  ;;  %v2078_v37 = vpop.f32.mrb[3].mxu1  ;;  %v2012_v39 = vmul.f32 -1.442695, %v502_v34 }
 0x3c7   : > { %2218 = vpow2.f32 %v2012_v39 }
 0x3cf   : > { %v2217_v38 = vpop.eup %2216 }
 0x3d0   : > { %517 = vrot.lane.b32.xlu0 %v2217_v38, %s2411_s22 }
 0x3d1   : > { %v2219_v40 = vpop.eup %2218 }
 0x3d2   : > { %v506_v41 = vadd.f32 1.0, %v2219_v40 }
 0x3d4   : > { %2220 = vrcp.f32 %v506_v41 }
 0x3de   : > { %v2221_v42 = vpop.eup %2220 }
 0x3df   : > { %v515_v46 = vmul.f32 %v2221_v42, %v513_v45 }
 0x442   : > { %v518_v43 = vpop.permute.xlu0 %517 }
 0x443   : > { %v520_v44 = vmul.f32 %v2221_v42, %v518_v43 }
 0x445   : > { %522 = vrot.lane.b32.xlu0 %v520_v44, %s2412_s24 }
 0x4b7   : > { %v523_v47 = vpop.permute.xlu0 %522 }
 0x4b8   : > { %v525_v48 = vadd.f32 %v523_v47, %v515_v46  ;;  %v2019_v47 = vld [vmem:[%s2514_s10 + $0x20] sm:$0xff] }
 0x4ba   : > { %2222 = vtanh.f32 %v525_v48 }
 0x4c4   : > { %v2223_v49 = vpop.eup %2222 }
 0x4c5   : > { %528 = vrot.lane.b32.xlu1 %v2223_v49, %s2411_s22 }
 0x4c9   : > { %533 = vrot.lane.b32.xlu1 %v525_v48, %s2413_s27 }
 0x537   : > { %v529_v50 = vpop.permute.xlu1 %528 }
 0x538   : > { %v2575_v51 = vmul.f32 %v2221_v42, %v529_v50 }
 0x53a   : > { %538 = vrot.lane.b32.xlu0 %v2575_v51, %s2412_s24 }
 0x53b   : > { %v534_v52 = vpop.permute.xlu1 %533 }
 0x53c   : > { %536 = vst.msk [vmem:[#allocation6] sm:$0xff] %vm257_vm2, %v534_v52 }
 0x543   : > { %v710_v53 = vld [vmem:[#allocation6] sm:$0xff] }
 0x544   : > { %712 = vrot.lane.b32.xlu1 %v710_v53, %s2412_s24 }
 0x5ac   : > { %v539_v54 = vpop.permute.xlu0 %538 }
 0x5ad   : > { %541 = vst.msk [vmem:[#allocation4] sm:$0xff] %vm257_vm2, %v539_v54 }
 0x5b4   : > { %v657_v55 = vld [vmem:[#allocation4] sm:$0xff] }
 0x5b5   : > { %v658_v56 = vpack.c.bf16 %v657_v55, %v657_v55 }
 0x5b6   : > { %v713_v9 = vpop.permute.xlu1 %712 }
 0x5b7   : > { %2084 = vmatmul.mubr.msk.bf16.vlgmr.msra.gmra.mrb[4].mxu0 %vm257_vm2, %v658_v56 }
 0x5b8   : > { %2096 = vmatpush3.bf16.msra.mxu0 %v2522_v1  ;;  %2099 = vmatprep.mubr.msk.bf16.mxu0 %vm2410_vm1, %v2409_v2 }
 0x5b9   : > { %2097 = vmatprep.subr.bf16.mxu0 %v2409_v2 }
 0x5bc   : > { %2098 = vmatpush3.bf16.msra.mxu0 %v2530_v3 }
 0x5bd   : > { %2111 = vmatprep.subr.bf16.mxu0 %v2409_v2 }
 0x68a   : > { %v696_v58 = vpop.f32.mrb[4].mxu0 }
 0x68b   : > { %v702_v59 = vadd.f32 %v2013_v57, %v696_v58  ;;  %v2085_v60 = vpop.f32.mrb[5].mxu0 }
 0x68c   : > { %v699_v61 = vpop.f32.mrb[6].mxu0 }
 0x68d   : > { %2224 = vtanh.f32 %v702_v59  ;;  %v2086_v62 = vpop.f32.mrb[7].mxu0  ;;  %v2015_v0 = vmul.f32 -1.442695, %v702_v59 }
 0x68f   : > { %2226 = vpow2.f32 %v2015_v0 }
 0x697   : > { %v2225_v63 = vpop.eup %2224 }
 0x698   : > { %717 = vrot.lane.b32.xlu0 %v2225_v63, %s2411_s22 }
 0x699   : > { %v2227_v4 = vpop.eup %2226 }
 0x69a   : > { %v706_v5 = vadd.f32 1.0, %v2227_v4 }
 0x69c   : > { %2228 = vrcp.f32 %v706_v5 }
 0x6a6   : > { %v2229_v6 = vpop.eup %2228 }
 0x6a7   : > { %v715_v10 = vmul.f32 %v2229_v6, %v713_v9 }
 0x70a   : > { %v718_v7 = vpop.permute.xlu0 %717 }
 0x70b   : > { %v720_v8 = vmul.f32 %v2229_v6, %v718_v7 }
 0x70d   : > { %722 = vrot.lane.b32.xlu0 %v720_v8, %s2412_s24 }
 0x77f   : > { %v723_v11 = vpop.permute.xlu0 %722 }
 0x780   : > { %v725_v12 = vadd.f32 %v723_v11, %v715_v10 }
 0x782   : > { %2230 = vtanh.f32 %v725_v12 }
 0x78c   : > { %v2231_v13 = vpop.eup %2230 }
 0x78d   : > { %728 = vrot.lane.b32.xlu1 %v2231_v13, %s2411_s22 }
 0x791   : > { %733 = vrot.lane.b32.xlu1 %v725_v12, %s2413_s27  ;;  %v2022_v12 = vld [vmem:[%s2514_s10 + $0x28] sm:$0xff] }
 0x7ff   : > { %v729_v14 = vpop.permute.xlu1 %728 }
 0x800   : > { %v2594_v15 = vmul.f32 %v2229_v6, %v729_v14 }
 0x802   : > { %738 = vrot.lane.b32.xlu0 %v2594_v15, %s2412_s24 }
 0x803   : > { %v734_v16 = vpop.permute.xlu1 %733 }
 0x804   : > { %736 = vst.msk [vmem:[#allocation6] sm:$0xff] %vm257_vm2, %v734_v16 }
 0x80b   : > { %v910_v17 = vld [vmem:[#allocation6] sm:$0xff] }
 0x80c   : > { %912 = vrot.lane.b32.xlu1 %v910_v17, %s2412_s24 }
 0x874   : > { %v739_v18 = vpop.permute.xlu0 %738 }
 0x875   : > { %741 = vst.msk [vmem:[#allocation4] sm:$0xff] %vm257_vm2, %v739_v18 }
 0x87c   : > { %v857_v19 = vld [vmem:[#allocation4] sm:$0xff] }
 0x87d   : > { %v858_v20 = vpack.c.bf16 %v857_v19, %v857_v19 }
 0x87e   : > { %v913_v35 = vpop.permute.xlu1 %912 }
 0x87f   : > { %2092 = vmatmul.mubr.msk.bf16.vlgmr.msra.gmra.mrb[4].mxu1 %vm257_vm2, %v858_v20 }
 0x880   : > { %2104 = vmatpush3.bf16.msra.mxu1 %v2522_v1  ;;  %2107 = vmatprep.mubr.msk.bf16.mxu1 %vm2410_vm1, %v2409_v2 }
 0x881   : > { %2105 = vmatprep.subr.bf16.mxu1 %v2409_v2 }
 0x884   : > { %2106 = vmatpush3.bf16.msra.mxu1 %v2530_v3 }
 0x885   : > { %2119 = vmatprep.subr.bf16.mxu1 %v2409_v2 }
 0x952   : > { %v896_v22 = vpop.f32.mrb[4].mxu1 }
 0x953   : > { %v902_v23 = vadd.f32 %v2016_v21, %v896_v22  ;;  %v2093_v24 = vpop.f32.mrb[5].mxu1 }
 0x954   : > { %v899_v25 = vpop.f32.mrb[6].mxu1 }
 0x955   : > { %2232 = vtanh.f32 %v902_v23  ;;  %v2094_v27 = vpop.f32.mrb[7].mxu1  ;;  %v2018_v29 = vmul.f32 -1.442695, %v902_v23 }
 0x957   : > { %2234 = vpow2.f32 %v2018_v29 }
 0x95f   : > { %v2233_v28 = vpop.eup %2232 }
 0x960   : > { %917 = vrot.lane.b32.xlu0 %v2233_v28, %s2411_s22 }
 0x961   : > { %v2235_v30 = vpop.eup %2234 }
 0x962   : > { %v906_v31 = vadd.f32 1.0, %v2235_v30 }
 0x964   : > { %2236 = vrcp.f32 %v906_v31 }
 0x96e   : > { %v2237_v32 = vpop.eup %2236 }
 0x96f   : > { %v915_v36 = vmul.f32 %v2237_v32, %v913_v35 }
 0x9d2   : > { %v918_v33 = vpop.permute.xlu0 %917 }
 0x9d3   : > { %v920_v34 = vmul.f32 %v2237_v32, %v918_v33 }
 0x9d5   : > { %922 = vrot.lane.b32.xlu0 %v920_v34, %s2412_s24 }
 0xa47   : > { %v923_v37 = vpop.permute.xlu0 %922 }
 0xa48   : > { %v925_v38 = vadd.f32 %v923_v37, %v915_v36  ;;  %v2025_v36 = vld [vmem:[%s2514_s10 + $0x30] sm:$0xff] }
 0xa4a   : > { %2238 = vtanh.f32 %v925_v38 }
 0xa54   : > { %v2239_v39 = vpop.eup %2238 }
 0xa55   : > { %928 = vrot.lane.b32.xlu1 %v2239_v39, %s2411_s22 }
 0xa59   : > { %933 = vrot.lane.b32.xlu1 %v925_v38, %s2413_s27 }
 0xac7   : > { %v929_v40 = vpop.permute.xlu1 %928 }
 0xac8   : > { %v2613_v41 = vmul.f32 %v2237_v32, %v929_v40 }
 0xaca   : > { %938 = vrot.lane.b32.xlu0 %v2613_v41, %s2412_s24 }
 0xacb   : > { %v934_v42 = vpop.permute.xlu1 %933 }
 0xacc   : > { %936 = vst.msk [vmem:[#allocation6] sm:$0xff] %vm257_vm2, %v934_v42 }
 0xad3   : > { %v1110_v43 = vld [vmem:[#allocation6] sm:$0xff] }
 0xad4   : > { %1112 = vrot.lane.b32.xlu1 %v1110_v43, %s2412_s24 }
 0xb3c   : > { %v939_v44 = vpop.permute.xlu0 %938 }
 0xb3d   : > { %941 = vst.msk [vmem:[#allocation4] sm:$0xff] %vm257_vm2, %v939_v44 }
 0xb44   : > { %v1057_v45 = vld [vmem:[#allocation4] sm:$0xff] }
 0xb45   : > { %v1058_v46 = vpack.c.bf16 %v1057_v45, %v1057_v45 }
 0xb46   : > { %v1113_v61 = vpop.permute.xlu1 %1112 }
 0xb47   : > { %2100 = vmatmul.mubr.msk.bf16.vlgmr.msra.gmra.mrb[8].mxu0 %vm257_vm2, %v1058_v46 }
 0xb48   : > { %2112 = vmatpush3.bf16.msra.mxu0 %v2522_v1  ;;  %2115 = vmatprep.mubr.msk.bf16.mxu0 %vm2410_vm1, %v2409_v2 }
 0xb49   : > { %2113 = vmatprep.subr.bf16.mxu0 %v2409_v2 }
 0xb4c   : > { %2114 = vmatpush3.bf16.msra.mxu0 %v2530_v3 }
 0xc1a   : > { %v1096_v48 = vpop.f32.mrb[8].mxu0 }
 0xc1b   : > { %v1102_v49 = vadd.f32 %v2019_v47, %v1096_v48  ;;  %v2101_v50 = vpop.f32.mrb[9].mxu0 }
 0xc1c   : > { %v1099_v52 = vpop.f32.mrb[10].mxu0 }
 0xc1d   : > { %2240 = vtanh.f32 %v1102_v49  ;;  %v2102_v53 = vpop.f32.mrb[11].mxu0  ;;  %v2021_v55 = vmul.f32 -1.442695, %v1102_v49 }
 0xc1f   : > { %2242 = vpow2.f32 %v2021_v55 }
 0xc27   : > { %v2241_v54 = vpop.eup %2240 }
 0xc28   : > { %1117 = vrot.lane.b32.xlu0 %v2241_v54, %s2411_s22 }
 0xc29   : > { %v2243_v56 = vpop.eup %2242 }
 0xc2a   : > { %v1106_v57 = vadd.f32 1.0, %v2243_v56  ;;  %v2414_v56 = vmov 1966171168  }
 0xc2c   : > { %2244 = vrcp.f32 %v1106_v57  ;;  %v343_v57 = vunpack.c.l.s4 %v2414_v56 }
 0xc36   : > { %v2245_v58 = vpop.eup %2244 }
 0xc37   : > { %v1115_v62 = vmul.f32 %v2245_v58, %v1113_v61 }
 0xc9a   : > { %v1118_v59 = vpop.permute.xlu0 %1117 }
 0xc9b   : > { %v1120_v60 = vmul.f32 %v2245_v58, %v1118_v59  ;;  %v344_v59 = vunpack.c.0.s8 %v343_v57 }
 0xc9d   : > { %1122 = vrot.lane.b32.xlu0 %v1120_v60, %s2412_s24 }
 0xd0f   : > { %v1123_v63 = vpop.permute.xlu0 %1122 }
 0xd10   : > { %v1125_v0 = vadd.f32 %v1123_v63, %v1115_v62 }
 0xd12   : > { %2246 = vtanh.f32 %v1125_v0 }
 0xd1c   : > { %v2247_v4 = vpop.eup %2246 }
 0xd1d   : > { %1128 = vrot.lane.b32.xlu1 %v2247_v4, %s2411_s22 }
 0xd21   : > { %1133 = vrot.lane.b32.xlu1 %v1125_v0, %s2413_s27 }
 0xd8f   : > { %v1129_v5 = vpop.permute.xlu1 %1128 }
 0xd90   : > { %v2631_v6 = vmul.f32 %v2245_v58, %v1129_v5  ;;  %v345_v58 = vlaneseq  ;;  %v341_v5 = vcombine.high %v2556_v26, %v2556_v26 }
 0xd92   : > { %1138 = vrot.lane.b32.xlu0 %v2631_v6, %s2412_s24  ;;  %v346_v60 = vshrl.u32 %v345_v58, 7 }
 0xd93   : > { %v1134_v7 = vpop.permute.xlu1 %1133 }
 0xd94   : > { %1136 = vst.msk [vmem:[#allocation6] sm:$0xff] %vm257_vm2, %v1134_v7  ;;  %v2662_v61 = vsub.s32 %v344_v59, %v346_v60 }
 0xd96   : > { %v348_v0 = vrot.slane %v2556_v26, %v2662_v61 }
 0xd98   : > { %v356_v7 = vcombine.high %v348_v0, %v348_v0 }
 0xd9b   : > { %v1310_v8 = vld [vmem:[#allocation6] sm:$0xff] }
 0xd9c   : > { %1312 = vrot.lane.b32.xlu1 %v1310_v8, %s2412_s24  ;;  %v2674_v8 = vrot.slane %v341_v5, %v2662_v61 }
 0xe04   : > { %v1139_v9 = vpop.permute.xlu0 %1138 }
 0xe05   : > { %1141 = vst.msk [vmem:[#allocation4] sm:$0xff] %vm257_vm2, %v1139_v9  ;;  %v2677_v9 = vrot.slane %v348_v0, %v2662_v61 }
 0xe0c   : > { %v1257_v10 = vld [vmem:[#allocation4] sm:$0xff] }
 0xe0d   : > { %v1258_v11 = vpack.c.bf16 %v1257_v10, %v1257_v10  ;;  %v2679_v10 = vsub.s32 0, %v346_v60 }
 0xe0f   : > { %2108 = vmatmul.mubr.msk.bf16.vlgmr.msra.gmra.mrb[8].mxu1 %vm257_vm2, %v1258_v11  ;;  %v2682_v11 = vrot.slane %v356_v7, %v2662_v61 }
 0xe10   : > { %2120 = vmatpush3.bf16.msra.mxu1 %v2522_v1  ;;  %2123 = vmatprep.mubr.msk.bf16.mxu1 %vm2410_vm1, %v2409_v2 }
 0xe11   : > { %2121 = vmatprep.subr.bf16.mxu1 %v2409_v2  ;;  %v388_v26 = vcombine.high %v2682_v11, %v2682_v11 }
 0xe14   : > { %2122 = vmatpush3.bf16.msra.mxu1 %v2530_v3  ;;  %v1313_v3 = vpop.permute.xlu1 %1312 }
 0xee2   : > { %v1296_v13 = vpop.f32.mrb[8].mxu1 }
 0xee3   : > { %v1302_v14 = vadd.f32 %v2022_v12, %v1296_v13  ;;  %v2109_v16 = vpop.f32.mrb[9].mxu1  ;;  %v393_v13 = vrot.slane %v2677_v9, %v2679_v10 }
 0xee4   : > { %v1299_v17 = vpop.f32.mrb[10].mxu1  ;;  %v2694_v16 = vrot.slane %v2575_v51, %v2662_v61 }
 0xee5   : > { %2248 = vtanh.f32 %v1302_v14  ;;  %v2110_v18 = vpop.f32.mrb[11].mxu1  ;;  %v2024_v20 = vmul.f32 -1.442695, %v1302_v14  ;;  %v357_v14 = vcombine.high %v2674_v8, %v2674_v8  ;;  %v405_v17 = vrot.slane %v388_v26, %v2679_v10 }
 0xee7   : > { %2250 = vpow2.f32 %v2024_v20  ;;  %v385_v18 = vrot.slane %v357_v14, %v2662_v61 }
 0xee9   : > { %v413_v20 = vrot.slane %v385_v18, %v2679_v10 }
 0xeef   : > { %v2249_v19 = vpop.eup %2248 }
 0xef0   : > { %1317 = vrot.lane.b32.xlu0 %v2249_v19, %s2411_s22  ;;  %v542_v19 = vcombine.high %v2575_v51, %v2575_v51 }
 0xef1   : > { %v2251_v1 = vpop.eup %2250 }
 0xef2   : > { %v1306_v21 = vadd.f32 1.0, %v2251_v1  ;;  %v389_v1 = vcombine.high %v385_v18, %v385_v18 }
 0xef4   : > { %2252 = vrcp.f32 %v1306_v21  ;;  %v557_v21 = vcombine.high %v2694_v16, %v2694_v16 }
 0xefe   : > { %v2253_v22 = vpop.eup %2252 }
 0xeff   : > { %v1315_v24 = vmul.f32 %v2253_v22, %v1313_v3 }
 0xf62   : > { %v1318_v23 = vpop.permute.xlu0 %1317 }
 0xf63   : > { %v1320_v2 = vmul.f32 %v2253_v22, %v1318_v23  ;;  %v421_v23 = vrot.slane %v389_v1, %v2679_v10 }
 0xf65   : > { %1322 = vrot.lane.b32.xlu0 %v1320_v2, %s2412_s24  ;;  %v579_v2 = vrot.slane %v557_v21, %v2662_v61  ;;  %v2028_v21 = vld [vmem:[%s2514_s10 + $0x38] sm:$0xff] }
 0xf67   : > { %v598_v3 = vrot.slane %v579_v2, %v2679_v10  ;;  %v589_v51 = vcombine.high %v579_v2, %v579_v2 }
 0xfd7   : > { %v1323_v25 = vpop.permute.xlu0 %1322 }
 0xfd8   : > { %v1325_v27 = vadd.f32 %v1323_v25, %v1315_v24  ;;  %v2717_v25 = vrot.slane %v2594_v15, %v2662_v61 }
 0xfda   : > { %2254 = vtanh.f32 %v1325_v27 }
 0xfe4   : > { %v2255_v28 = vpop.eup %2254 }
 0xfe5   : > { %1328 = vrot.lane.b32.xlu1 %v2255_v28, %s2411_s22 }
 0xfe9   : > { %1333 = vrot.lane.b32.xlu1 %v1325_v27, %s2413_s27  ;;  %v606_v27 = vrot.slane %v589_v51, %v2679_v10 }
0x1057   : > { %v1329_v29 = vpop.permute.xlu1 %1328 }
0x1058   : > { %v2649_v30 = vmul.f32 %v2253_v22, %v1329_v29  ;;  %v2706_v22 = vrot.slane %v542_v19, %v2662_v61  ;;  %v742_v29 = vcombine.high %v2594_v15, %v2594_v15 }
0x105a   : > { %1338 = vrot.lane.b32.xlu0 %v2649_v30, %s2412_s24  ;;  %v558_v24 = vcombine.high %v2706_v22, %v2706_v22 }
0x105b   : > { %v1334_v31 = vpop.permute.xlu1 %1333 }
0x105c   : > { %1336 = vst.msk [vmem:[#allocation6] sm:$0xff] %vm257_vm2, %v1334_v31  ;;  %v586_v28 = vrot.slane %v558_v24, %v2662_v61  ;;  %v757_v31 = vcombine.high %v2717_v25, %v2717_v25 }
0x1063   : > { %v1510_v32 = vld [vmem:[#allocation6] sm:$0xff] }
0x1064   : > { %1512 = vrot.lane.b32.xlu1 %v1510_v32, %s2412_s24  ;;  %v614_v32 = vrot.slane %v586_v28, %v2679_v10 }
0x10cc   : > { %v1339_v33 = vpop.permute.xlu0 %1338 }
0x10cd   : > { %1341 = vst.msk [vmem:[#allocation4] sm:$0xff] %vm257_vm2, %v1339_v33  ;;  %v590_v33 = vcombine.high %v586_v28, %v586_v28 }
0x10d4   : > { %v1457_v34 = vld [vmem:[#allocation4] sm:$0xff] }
0x10d5   : > { %v1458_v35 = vpack.c.bf16 %v1457_v34, %v1457_v34  ;;  %v2729_v34 = vrot.slane %v742_v29, %v2662_v61 }
0x10d6   : > { %v1513_v50 = vpop.permute.xlu1 %1512 }
0x10d7   : > { %2116 = vmatmul.mubr.msk.bf16.vlgmr.msra.gmra.mrb[12].mxu0 %vm257_vm2, %v1458_v35  ;;  %v622_v35 = vrot.slane %v590_v33, %v2679_v10 }
0x11aa   : > { %v1496_v37 = vpop.f32.mrb[12].mxu0 }
0x11ab   : > { %v1502_v38 = vadd.f32 %v2025_v36, %v1496_v37  ;;  %v2117_v39 = vpop.f32.mrb[13].mxu0  ;;  %v779_v36 = vrot.slane %v757_v31, %v2662_v61 }
0x11ac   : > { %v1499_v40 = vpop.f32.mrb[14].mxu0  ;;  %v2740_v39 = vrot.slane %v2613_v41, %v2662_v61 }
0x11ad   : > { %2256 = vtanh.f32 %v1502_v38  ;;  %v2118_v42 = vpop.f32.mrb[15].mxu0  ;;  %v2027_v44 = vmul.f32 -1.442695, %v1502_v38  ;;  %v798_v37 = vrot.slane %v779_v36, %v2679_v10  ;;  %v789_v15 = vcombine.high %v779_v36, %v779_v36 }
0x11ae   : > { %v758_v38 = vcombine.high %v2729_v34, %v2729_v34  ;;  %v397_v36 = vrot.slane %v2682_v11, %v2679_v10  ;;  %v565_v11 = vrot.slane %v2694_v16, %v2662_v61 }
0x11af   : > { %2258 = vpow2.f32 %v2027_v44  ;;  %v806_v40 = vrot.slane %v789_v15, %v2679_v10  ;;  %v957_v44 = vcombine.high %v2740_v39, %v2740_v39 }
0x11b0   : > { %v786_v42 = vrot.slane %v758_v38, %v2662_v61  ;;  %v371_v38 = vrot.slane %v2674_v8, %v2662_v61 }
0x11b7   : > { %v2257_v43 = vpop.eup %2256 }
0x11b8   : > { %1517 = vrot.lane.b32.xlu0 %v2257_v43, %s2411_s22  ;;  %v942_v43 = vcombine.high %v2613_v41, %v2613_v41 }
0x11b9   : > { %v2259_v45 = vpop.eup %2258 }
0x11ba   : > { %v1506_v46 = vadd.f32 1.0, %v2259_v45  ;;  %v814_v45 = vrot.slane %v786_v42, %v2679_v10 }
0x11bc   : > { %2260 = vrcp.f32 %v1506_v46  ;;  %v790_v46 = vcombine.high %v786_v42, %v786_v42  ;;  %v387_v42 = vcombine.high %v371_v38, %v371_v38 }
0x11c6   : > { %v2261_v47 = vpop.eup %2260 }
0x11c7   : > { %v1515_v52 = vmul.f32 %v2261_v47, %v1513_v50 }
0x122a   : > { %v1518_v48 = vpop.permute.xlu0 %1517 }
0x122b   : > { %v1520_v49 = vmul.f32 %v2261_v47, %v1518_v48  ;;  %v822_v48 = vrot.slane %v790_v46, %v2679_v10 }
0x122d   : > { %1522 = vrot.lane.b32.xlu0 %v1520_v49, %s2412_s24  ;;  %v979_v49 = vrot.slane %v957_v44, %v2662_v61  ;;  %v587_v44 = vcombine.high %v565_v11, %v565_v11 }
0x122f   : > { %v998_v50 = vrot.slane %v979_v49, %v2679_v10  ;;  %v989_v41 = vcombine.high %v979_v49, %v979_v49  ;;  %v602_v8 = vrot.slane %v587_v44, %v2679_v10  ;;  %v765_v49 = vrot.slane %v2717_v25, %v2662_v61 }
0x129f   : > { %v1523_v53 = vpop.permute.xlu0 %1522 }
0x12a0   : > { %v1525_v54 = vadd.f32 %v1523_v53, %v1515_v52  ;;  %v1006_v53 = vrot.slane %v989_v41, %v2679_v10  ;;  %v787_v41 = vcombine.high %v765_v49, %v765_v49 }
0x12a2   : > { %2262 = vtanh.f32 %v1525_v54 }
0x12ac   : > { %v2263_v55 = vpop.eup %2262 }
0x12ad   : > { %1528 = vrot.lane.b32.xlu1 %v2263_v55, %s2411_s22 }
0x12b1   : > { %1533 = vrot.lane.b32.xlu1 %v1525_v54, %s2413_s27 }
0x131f   : > { %v1529_v62 = vpop.permute.xlu1 %1528 }
0x1320   : > { %v2664_v63 = vmul.f32 %v2261_v47, %v1529_v62  ;;  %v2752_v47 = vrot.slane %v942_v43, %v2662_v61  ;;  %v417_v43 = vrot.slane %v387_v42, %v2679_v10 }
0x1322   : > { %1538 = vrot.lane.b32.xlu0 %v2664_v63, %s2412_s24  ;;  %v958_v52 = vcombine.high %v2752_v47, %v2752_v47 }
0x1323   : > { %v1534_v4 = vpop.permute.xlu1 %1533 }
0x1324   : > { %1536 = vst.msk [vmem:[#allocation6] sm:$0xff] %vm257_vm2, %v1534_v4  ;;  %v2763_v54 = vrot.slane %v958_v52, %v2662_v61  ;;  %v772_v52 = vrot.slane %v2729_v34, %v2662_v61 }
0x1326   : > { %v1014_v55 = vrot.slane %v2763_v54, %v2679_v10 }
0x132b   : > { %v1710_v12 = vld [vmem:[#allocation6] sm:$0xff] }
0x132c   : > { %1712 = vrot.lane.b32.xlu1 %v1710_v12, %s2412_s24 }
0x1330   : > { %422 = vrot.lane.b32.xlu1 %v393_v13, %s2412_s24 }
0x1334   : > { %428 = vrot.lane.b32.xlu1 %v405_v17, %s2412_s24 }
0x1338   : > { %432 = vrot.lane.b32.xlu1 %v413_v20, %s2412_s24 }
0x133c   : > { %436 = vrot.lane.b32.xlu1 %v421_v23, %s2412_s24 }
0x1340   : > { %625 = vrot.lane.b32.xlu1 %v598_v3, %s2412_s24 }
0x1344   : > { %629 = vrot.lane.b32.xlu1 %v606_v27, %s2412_s24 }
0x1348   : > { %633 = vrot.lane.b32.xlu1 %v614_v32, %s2412_s24 }
0x134c   : > { %637 = vrot.lane.b32.xlu1 %v622_v35, %s2412_s24 }
0x1350   : > { %825 = vrot.lane.b32.xlu1 %v798_v37, %s2412_s24  ;;  %v386_v37 = vcombine.high %v2677_v9, %v2677_v9  ;;  %v594_v9 = vrot.slane %v565_v11, %v2679_v10 }
0x1352   : > { %v401_v15 = vrot.slane %v386_v37, %v2679_v10 }
0x1354   : > { %829 = vrot.lane.b32.xlu1 %v806_v40, %s2412_s24  ;;  %v409_v40 = vrot.slane %v371_v38, %v2679_v10 }
0x1358   : > { %833 = vrot.lane.b32.xlu1 %v814_v45, %s2412_s24  ;;  %v572_v45 = vrot.slane %v2706_v22, %v2662_v61  ;;  %v802_v22 = vrot.slane %v787_v41, %v2679_v10 }
0x135a   : > { %v610_v46 = vrot.slane %v572_v45, %v2679_v10 }
0x135c   : > { %837 = vrot.lane.b32.xlu1 %v822_v48, %s2412_s24  ;;  %v588_v48 = vcombine.high %v572_v45, %v572_v45 }
0x135e   : > { %v618_v16 = vrot.slane %v588_v48, %v2679_v10 }
0x1360   : > { %1025 = vrot.lane.b32.xlu1 %v998_v50, %s2412_s24  ;;  %v794_v50 = vrot.slane %v765_v49, %v2679_v10 }
0x1364   : > { %1029 = vrot.lane.b32.xlu1 %v1006_v53, %s2412_s24  ;;  %v810_v53 = vrot.slane %v772_v52, %v2679_v10 }
0x1368   : > { %1033 = vrot.lane.b32.xlu1 %v1014_v55, %s2412_s24  ;;  %v788_v55 = vcombine.high %v772_v52, %v772_v52 }
0x136a   : > { %v818_v25 = vrot.slane %v788_v55, %v2679_v10 }
0x1394   : > { %v1539_v56 = vpop.permute.xlu0 %1538 }
0x1395   : > { %1541 = vst.msk [vmem:[#allocation4] sm:$0xff] %vm257_vm2, %v1539_v56  ;;  %v965_v56 = vrot.slane %v2740_v39, %v2662_v61  ;;  %v2858_v39 = vrot.slane %v2631_v6, %v2662_v61 }
0x1397   : > { %v1157_v49 = vcombine.high %v2858_v39, %v2858_v39 }
0x139c   : > { %v1657_v57 = vld [vmem:[#allocation4] sm:$0xff] }
0x139d   : > { %v1658_v58 = vpack.c.bf16 %v1657_v57, %v1657_v57  ;;  %v994_v57 = vrot.slane %v965_v56, %v2679_v10 }
0x139e   : > { %v2770_v59 = vpop.permute.xlu1 %1712 }
0x139f   : > { %2124 = vmatmul.mubr.msk.bf16.vlgmr.msra.gmra.mrb[12].mxu1 %vm257_vm2, %v1658_v58  ;;  %v987_v58 = vcombine.high %v965_v56, %v965_v56 }
0x13a1   : > { %v1002_v34 = vrot.slane %v987_v58, %v2679_v10 }
0x13a2   : > { %v423_v60 = vpop.permute.xlu1 %422 }
0x13a3   : > { %447 = vst.msk [vmem:[%s2516_s11] sm:$0x1] %vm446_vm3, %v423_v60  ;;  %v972_v60 = vrot.slane %v2752_v47, %v2662_v61  ;;  %v1165_v47 = vrot.slane %v2858_v39, %v2662_v61 }
0x13a6   : > { %v429_v62 = vpop.permute.xlu1 %428 }
0x13a7   : > { %450 = vst.msk [vmem:[%s2516_s11 + $0x18] sm:$0x1] %vm446_vm3, %v429_v62  ;;  %v1142_v62 = vcombine.high %v2631_v6, %v2631_v6 }
0x13aa   : > { %v433_v0 = vpop.permute.xlu1 %432 }
0x13ab   : > { %452 = vst.msk [vmem:[%s2516_s11 + $0x28] sm:$0x1] %vm446_vm3, %v433_v0  ;;  %v1010_v0 = vrot.slane %v972_v60, %v2679_v10 }
0x13ae   : > { %v437_v4 = vpop.permute.xlu1 %436 }
0x13af   : > { %454 = vst.msk [vmem:[%s2516_s11 + $0x38] sm:$0x1] %vm446_vm3, %v437_v4  ;;  %v988_v4 = vcombine.high %v972_v60, %v972_v60 }
0x13b2   : > { %v626_v5 = vpop.permute.xlu1 %625 }
0x13b3   : > { %648 = vst.msk [vmem:[%s2516_s11 + $0x9] sm:$0x1] %vm446_vm3, %v626_v5  ;;  %v2863_v5 = vrot.slane %v1142_v62, %v2662_v61 }
0x13b5   : > { %v1158_v6 = vcombine.high %v2863_v5, %v2863_v5  ;;  %v1172_v58 = vrot.slane %v2863_v5, %v2662_v61 }
0x13b6   : > { %v630_v7 = vpop.permute.xlu1 %629 }
0x13b7   : > { %650 = vst.msk [vmem:[%s2516_s11 + $0x19] sm:$0x1] %vm446_vm3, %v630_v7  ;;  %v1018_v7 = vrot.slane %v988_v4, %v2679_v10  ;;  %v1210_v60 = vrot.slane %v1172_v58, %v2679_v10  ;;  %v1188_v62 = vcombine.high %v1172_v58, %v1172_v58 }
0x13ba   : > { %v634_v12 = vpop.permute.xlu1 %633 }
0x13bb   : > { %652 = vst.msk [vmem:[%s2516_s11 + $0x29] sm:$0x1] %vm446_vm3, %v634_v12  ;;  %v1194_v12 = vrot.slane %v1165_v47, %v2679_v10 }
0x13be   : > { %v638_v13 = vpop.permute.xlu1 %637 }
0x13bf   : > { %654 = vst.msk [vmem:[%s2516_s11 + $0x39] sm:$0x1] %vm446_vm3, %v638_v13  ;;  %v1187_v13 = vcombine.high %v1165_v47, %v1165_v47 }
0x13c2   : > { %v826_v26 = vpop.permute.xlu1 %825 }
0x13c3   : > { %848 = vst.msk [vmem:[%s2516_s11 + $0xa] sm:$0x1] %vm446_vm3, %v826_v26  ;;  %v2875_v26 = vrot.slane %v2649_v30, %v2662_v61 }
0x13c5   : > { %v1365_v4 = vrot.slane %v2875_v26, %v2662_v61 }
0x13c6   : > { %v830_v14 = vpop.permute.xlu1 %829 }
0x13c7   : > { %850 = vst.msk [vmem:[%s2516_s11 + $0x1a] sm:$0x1] %vm446_vm3, %v830_v14  ;;  %v1202_v14 = vrot.slane %v1187_v13, %v2679_v10  ;;  %v1387_v47 = vcombine.high %v1365_v4, %v1365_v4 }
0x13c9   : > { %v1402_v13 = vrot.slane %v1387_v47, %v2679_v10 }
0x13ca   : > { %v834_v17 = vpop.permute.xlu1 %833 }
0x13cb   : > { %852 = vst.msk [vmem:[%s2516_s11 + $0x2a] sm:$0x1] %vm446_vm3, %v834_v17  ;;  %v1186_v17 = vrot.slane %v1158_v6, %v2662_v61 }
0x13ce   : > { %v838_v18 = vpop.permute.xlu1 %837 }
0x13cf   : > { %854 = vst.msk [vmem:[%s2516_s11 + $0x3a] sm:$0x1] %vm446_vm3, %v838_v18  ;;  %v1342_v18 = vcombine.high %v2649_v30, %v2649_v30 }
0x13d2   : > { %v1026_v19 = vpop.permute.xlu1 %1025 }
0x13d3   : > { %1048 = vst.msk [vmem:[%s2516_s11 + $0xb] sm:$0x1] %vm446_vm3, %v1026_v19  ;;  %v1357_v19 = vcombine.high %v2875_v26, %v2875_v26 }
0x13d6   : > { %v1030_v20 = vpop.permute.xlu1 %1029 }
0x13d7   : > { %1050 = vst.msk [vmem:[%s2516_s11 + $0x1b] sm:$0x1] %vm446_vm3, %v1030_v20  ;;  %v1214_v20 = vrot.slane %v1186_v17, %v2679_v10 }
0x13da   : > { %v1034_v1 = vpop.permute.xlu1 %1033 }
0x13db   : > { %1052 = vst.msk [vmem:[%s2516_s11 + $0x2b] sm:$0x1] %vm446_vm3, %v1034_v1  ;;  %v1190_v1 = vcombine.high %v1186_v17, %v1186_v17 }
0x1472   : > { %v1696_v23 = vpop.f32.mrb[12].mxu1 }
0x1473   : > { %v1702_v2 = vadd.f32 %v2028_v21, %v1696_v23  ;;  %v2125_v3 = vpop.f32.mrb[13].mxu1  ;;  %v2887_v21 = vrot.slane %v1342_v18, %v2662_v61  ;;  %v1222_v23 = vrot.slane %v1190_v1, %v2679_v10 }
0x1474   : > { %v1699_v51 = vpop.f32.mrb[14].mxu1 }
0x1475   : > { %2264 = vtanh.f32 %v1702_v2  ;;  %v2126_v24 = vpop.f32.mrb[15].mxu1  ;;  %v2030_v28 = vmul.f32 -1.442695, %v1702_v2  ;;  %v1379_v2 = vrot.slane %v1357_v19, %v2662_v61  ;;  %v1358_v51 = vcombine.high %v2887_v21, %v2887_v21 }
0x1476   : > { %v2898_v24 = vrot.slane %v2664_v63, %v2662_v61  ;;  %v1372_v6 = vrot.slane %v2887_v21, %v2662_v61 }
0x1477   : > { %2266 = vpow2.f32 %v2030_v28  ;;  %v1398_v3 = vrot.slane %v1379_v2, %v2679_v10  ;;  %v1389_v30 = vcombine.high %v1379_v2, %v1379_v2  ;;  %v1386_v28 = vrot.slane %v1358_v51, %v2662_v61 }
0x1478   : > { %v1388_v17 = vcombine.high %v1372_v6, %v1372_v6 }
0x147a   : > { %v1418_v19 = vrot.slane %v1388_v17, %v2679_v10 }
0x147f   : > { %v2265_v27 = vpop.eup %2264 }
0x1480   : > { %1717 = vrot.lane.b32.xlu0 %v2265_v27, %s2411_s22  ;;  %v1406_v27 = vrot.slane %v1389_v30, %v2679_v10 }
0x1481   : > { %v2267_v29 = vpop.eup %2266 }
0x1482   : > { %v1706_v31 = vadd.f32 1.0, %v2267_v29  ;;  %v1542_v29 = vcombine.high %v2664_v63, %v2664_v63 }
0x1484   : > { %2268 = vrcp.f32 %v1706_v31  ;;  %v1557_v31 = vcombine.high %v2898_v24, %v2898_v24 }
0x148e   : > { %v2805_v32 = vpop.eup %2268 }
0x14f2   : > { %v1718_v33 = vpop.permute.xlu0 %1717 }
0x14f3   : > { %v1720_v35 = vmul.f32 %v2805_v32, %v1718_v33  ;;  %v1414_v33 = vrot.slane %v1386_v28, %v2679_v10 }
0x14f5   : > { %1722 = vrot.lane.b32.xlu0 %v1720_v35, %s2412_s24  ;;  %v1390_v35 = vcombine.high %v1386_v28, %v1386_v28 }
0x14f7   : > { %v1422_v37 = vrot.slane %v1390_v35, %v2679_v10 }
0x14f9   : > { %424 = vrot.lane.b32.xlu0 %v397_v36, %s2412_s24  ;;  %v2910_v36 = vrot.slane %v1542_v29, %v2662_v61 }
0x14fb   : > { %v1558_v63 = vcombine.high %v2910_v36, %v2910_v36  ;;  %v1572_v2 = vrot.slane %v2910_v36, %v2662_v61 }
0x14fd   : > { %426 = vrot.lane.b32.xlu0 %v401_v15, %s2412_s24  ;;  %v1579_v15 = vrot.slane %v1557_v31, %v2662_v61 }
0x14ff   : > { %v1598_v38 = vrot.slane %v1579_v15, %v2679_v10 }
0x1501   : > { %430 = vrot.lane.b32.xlu0 %v409_v40, %s2412_s24  ;;  %v1589_v40 = vcombine.high %v1579_v15, %v1579_v15 }
0x1503   : > { %v1606_v42 = vrot.slane %v1589_v40, %v2679_v10 }
0x1505   : > { %434 = vrot.lane.b32.xlu0 %v417_v43, %s2412_s24  ;;  %v1586_v43 = vrot.slane %v1558_v63, %v2662_v61 }
0x1507   : > { %v1614_v11 = vrot.slane %v1586_v43, %v2679_v10 }
0x1509   : > { %623 = vrot.lane.b32.xlu0 %v594_v9, %s2412_s24  ;;  %v1590_v9 = vcombine.high %v1586_v43, %v1586_v43 }
0x150b   : > { %v1622_v44 = vrot.slane %v1590_v9, %v2679_v10 }
0x150d   : > { %627 = vrot.lane.b32.xlu0 %v602_v8, %s2412_s24  ;;  %v1715_v8 = vmul.f32 %v2805_v32, %v2770_v59  ;;  %v990_v59 = vcombine.high %v2763_v54, %v2763_v54 }
0x150f   : > { %v1022_v52 = vrot.slane %v990_v59, %v2679_v10 }
0x1511   : > { %631 = vrot.lane.b32.xlu0 %v610_v46, %s2412_s24 }
0x1515   : > { %635 = vrot.lane.b32.xlu0 %v618_v16, %s2412_s24 }
0x1519   : > { %823 = vrot.lane.b32.xlu0 %v794_v50, %s2412_s24 }
0x151d   : > { %827 = vrot.lane.b32.xlu0 %v802_v22, %s2412_s24 }
0x1521   : > { %831 = vrot.lane.b32.xlu0 %v810_v53, %s2412_s24  ;;  %v1179_v53 = vrot.slane %v1157_v49, %v2662_v61 }
0x1523   : > { %v1189_v54 = vcombine.high %v1179_v53, %v1179_v53 }
0x1525   : > { %835 = vrot.lane.b32.xlu0 %v818_v25, %s2412_s24  ;;  %v1198_v25 = vrot.slane %v1179_v53, %v2679_v10 }
0x1529   : > { %1023 = vrot.lane.b32.xlu0 %v994_v57, %s2412_s24  ;;  %v1206_v57 = vrot.slane %v1189_v54, %v2679_v10 }
0x152d   : > { %1027 = vrot.lane.b32.xlu0 %v1002_v34, %s2412_s24 }
0x1531   : > { %1031 = vrot.lane.b32.xlu0 %v1010_v0, %s2412_s24  ;;  %v1218_v0 = vrot.slane %v1188_v62, %v2679_v10 }
0x1535   : > { %1035 = vrot.lane.b32.xlu0 %v1018_v7, %s2412_s24  ;;  %v1394_v7 = vrot.slane %v1365_v4, %v2679_v10 }
0x1539   : > { %1223 = vrot.lane.b32.xlu0 %v1194_v12, %s2412_s24 }
0x153d   : > { %1227 = vrot.lane.b32.xlu0 %v1202_v14, %s2412_s24  ;;  %v1410_v14 = vrot.slane %v1372_v6, %v2679_v10 }
0x1541   : > { %1233 = vrot.lane.b32.xlu0 %v1214_v20, %s2412_s24  ;;  %v1565_v20 = vrot.slane %v2898_v24, %v2662_v61  ;;  %v1610_v24 = vrot.slane %v1572_v2, %v2679_v10 }
0x1543   : > { %v1594_v21 = vrot.slane %v1565_v20, %v2679_v10 }
0x1545   : > { %1237 = vrot.lane.b32.xlu0 %v1222_v23, %s2412_s24  ;;  %v1587_v23 = vcombine.high %v1565_v20, %v1565_v20 }
0x1547   : > { %v1602_v30 = vrot.slane %v1587_v23, %v2679_v10 }
0x1549   : > { %1425 = vrot.lane.b32.xlu0 %v1398_v3, %s2412_s24 }
0x154d   : > { %1429 = vrot.lane.b32.xlu0 %v1406_v27, %s2412_s24  ;;  %v1588_v27 = vcombine.high %v1572_v2, %v1572_v2 }
0x154f   : > { %v1618_v29 = vrot.slane %v1588_v27, %v2679_v10 }
0x1551   : > { %1433 = vrot.lane.b32.xlu0 %v1414_v33, %s2412_s24 }
0x1555   : > { %1437 = vrot.lane.b32.xlu0 %v1422_v37, %s2412_s24 }
0x1559   : > { %1625 = vrot.lane.b32.xlu0 %v1598_v38, %s2412_s24 }
0x155d   : > { %1629 = vrot.lane.b32.xlu0 %v1606_v42, %s2412_s24 }
0x1561   : > { %1633 = vrot.lane.b32.xlu0 %v1614_v11, %s2412_s24 }
0x1565   : > { %1637 = vrot.lane.b32.xlu0 %v1622_v44, %s2412_s24 }
0x1567   : > { %v1723_v45 = vpop.permute.xlu0 %1722 }
0x1568   : > { %v2928_v46 = vadd.f32 %v1723_v45, %v1715_v8 }
0x156a   : > { %2270 = vtanh.f32 %v2928_v46 }
0x156b   : > { %v425_v48 = vpop.permute.xlu0 %424 }
0x156c   : > { %448 = vst.msk [vmem:[%s2516_s11 + $0x8] sm:$0x1] %vm446_vm3, %v425_v48 }
0x156f   : > { %v427_v16 = vpop.permute.xlu0 %426 }
0x1570   : > { %449 = vst.msk [vmem:[%s2516_s11 + $0x10] sm:$0x1] %vm446_vm3, %v427_v16 }
0x1573   : > { %v431_v50 = vpop.permute.xlu0 %430 }
0x1574   : > { %v2271_v41 = vpop.eup %2270  ;;  %451 = vst.msk [vmem:[%s2516_s11 + $0x20] sm:$0x1] %vm446_vm3, %v431_v50 }
0x1575   : > { %1728 = vrot.lane.b32.xlu1 %v2271_v41, %s2411_s22 }
0x1577   : > { %v435_v22 = vpop.permute.xlu0 %434 }
0x1578   : > { %453 = vst.msk [vmem:[%s2516_s11 + $0x30] sm:$0x1] %vm446_vm3, %v435_v22 }
0x1579   : > { %1037 = vrot.lane.b32.xlu1 %v1022_v52, %s2412_s24 }
0x157b   : > { %v624_v55 = vpop.permute.xlu0 %623 }
0x157c   : > { %647 = vst.msk [vmem:[%s2516_s11 + $0x1] sm:$0x1] %vm446_vm3, %v624_v55 }
0x157d   : > { %1225 = vrot.lane.b32.xlu1 %v1198_v25, %s2412_s24 }
0x157f   : > { %v628_v56 = vpop.permute.xlu0 %627 }
0x1580   : > { %649 = vst.msk [vmem:[%s2516_s11 + $0x11] sm:$0x1] %vm446_vm3, %v628_v56 }
0x1581   : > { %1229 = vrot.lane.b32.xlu1 %v1206_v57, %s2412_s24 }
0x1583   : > { %v632_v34 = vpop.permute.xlu0 %631 }
0x1584   : > { %651 = vst.msk [vmem:[%s2516_s11 + $0x21] sm:$0x1] %vm446_vm3, %v632_v34 }
0x1585   : > { %1231 = vrot.lane.b32.xlu1 %v1210_v60, %s2412_s24 }
0x1587   : > { %v636_v39 = vpop.permute.xlu0 %635 }
0x1588   : > { %653 = vst.msk [vmem:[%s2516_s11 + $0x31] sm:$0x1] %vm446_vm3, %v636_v39 }
0x1589   : > { %1235 = vrot.lane.b32.xlu1 %v1218_v0, %s2412_s24 }
0x158b   : > { %v824_v5 = vpop.permute.xlu0 %823 }
0x158c   : > { %847 = vst.msk [vmem:[%s2516_s11 + $0x2] sm:$0x1] %vm446_vm3, %v824_v5 }
0x158d   : > { %1423 = vrot.lane.b32.xlu1 %v1394_v7, %s2412_s24 }
0x158f   : > { %v828_v12 = vpop.permute.xlu0 %827 }
0x1590   : > { %849 = vst.msk [vmem:[%s2516_s11 + $0x12] sm:$0x1] %vm446_vm3, %v828_v12 }
0x1591   : > { %1427 = vrot.lane.b32.xlu1 %v1402_v13, %s2412_s24 }
0x1593   : > { %v832_v26 = vpop.permute.xlu0 %831 }
0x1594   : > { %851 = vst.msk [vmem:[%s2516_s11 + $0x22] sm:$0x1] %vm446_vm3, %v832_v26 }
0x1595   : > { %1431 = vrot.lane.b32.xlu1 %v1410_v14, %s2412_s24 }
0x1597   : > { %v836_v18 = vpop.permute.xlu0 %835 }
0x1598   : > { %853 = vst.msk [vmem:[%s2516_s11 + $0x32] sm:$0x1] %vm446_vm3, %v836_v18 }
0x1599   : > { %1435 = vrot.lane.b32.xlu1 %v1418_v19, %s2412_s24 }
0x159b   : > { %v1024_v1 = vpop.permute.xlu0 %1023 }
0x159c   : > { %1047 = vst.msk [vmem:[%s2516_s11 + $0x3] sm:$0x1] %vm446_vm3, %v1024_v1 }
0x159d   : > { %1623 = vrot.lane.b32.xlu1 %v1594_v21, %s2412_s24 }
0x159f   : > { %v1028_v3 = vpop.permute.xlu0 %1027 }
0x15a0   : > { %1049 = vst.msk [vmem:[%s2516_s11 + $0x13] sm:$0x1] %vm446_vm3, %v1028_v3 }
0x15a1   : > { %1627 = vrot.lane.b32.xlu1 %v1602_v30, %s2412_s24 }
0x15a3   : > { %v1032_v51 = vpop.permute.xlu0 %1031 }
0x15a4   : > { %1051 = vst.msk [vmem:[%s2516_s11 + $0x23] sm:$0x1] %vm446_vm3, %v1032_v51 }
0x15a5   : > { %1631 = vrot.lane.b32.xlu1 %v1610_v24, %s2412_s24 }
0x15a7   : > { %v1036_v28 = vpop.permute.xlu0 %1035 }
0x15a8   : > { %1053 = vst.msk [vmem:[%s2516_s11 + $0x33] sm:$0x1] %vm446_vm3, %v1036_v28 }
0x15a9   : > { %1635 = vrot.lane.b32.xlu1 %v1618_v29, %s2412_s24 }
0x15ab   : > { %v1224_v31 = vpop.permute.xlu0 %1223 }
0x15ac   : > { %1247 = vst.msk [vmem:[%s2516_s11 + $0x4] sm:$0x1] %vm446_vm3, %v1224_v31 }
0x15ad   : > { %1733 = vrot.lane.b32.xlu1 %v2928_v46, %s2413_s27 }
0x15af   : > { %v1228_v33 = vpop.permute.xlu0 %1227 }
0x15b0   : > { %1249 = vst.msk [vmem:[%s2516_s11 + $0x14] sm:$0x1] %vm446_vm3, %v1228_v33 }
0x15b3   : > { %v1234_v35 = vpop.permute.xlu0 %1233 }
0x15b4   : > { %1252 = vst.msk [vmem:[%s2516_s11 + $0x2c] sm:$0x1] %vm446_vm3, %v1234_v35 }
0x15b7   : > { %v1238_v36 = vpop.permute.xlu0 %1237 }
0x15b8   : > { %1254 = vst.msk [vmem:[%s2516_s11 + $0x3c] sm:$0x1] %vm446_vm3, %v1238_v36 }
0x15bb   : > { %v1426_v37 = vpop.permute.xlu0 %1425 }
0x15bc   : > { %1448 = vst.msk [vmem:[%s2516_s11 + $0xd] sm:$0x1] %vm446_vm3, %v1426_v37 }
0x15bf   : > { %v1430_v15 = vpop.permute.xlu0 %1429 }
0x15c0   : > { %1450 = vst.msk [vmem:[%s2516_s11 + $0x1d] sm:$0x1] %vm446_vm3, %v1430_v15 }
0x15c3   : > { %v1434_v63 = vpop.permute.xlu0 %1433 }
0x15c4   : > { %1452 = vst.msk [vmem:[%s2516_s11 + $0x2d] sm:$0x1] %vm446_vm3, %v1434_v63 }
0x15c7   : > { %v1438_v38 = vpop.permute.xlu0 %1437 }
0x15c8   : > { %1454 = vst.msk [vmem:[%s2516_s11 + $0x3d] sm:$0x1] %vm446_vm3, %v1438_v38 }
0x15cb   : > { %v1626_v40 = vpop.permute.xlu0 %1625 }
0x15cc   : > { %1648 = vst.msk [vmem:[%s2516_s11 + $0xe] sm:$0x1] %vm446_vm3, %v1626_v40 }
0x15cf   : > { %v1630_v42 = vpop.permute.xlu0 %1629 }
0x15d0   : > { %1650 = vst.msk [vmem:[%s2516_s11 + $0x1e] sm:$0x1] %vm446_vm3, %v1630_v42 }
0x15d3   : > { %v1634_v43 = vpop.permute.xlu0 %1633 }
0x15d4   : > { %1652 = vst.msk [vmem:[%s2516_s11 + $0x2e] sm:$0x1] %vm446_vm3, %v1634_v43 }
0x15d7   : > { %v1638_v11 = vpop.permute.xlu0 %1637 }
0x15d8   : > { %1654 = vst.msk [vmem:[%s2516_s11 + $0x3e] sm:$0x1] %vm446_vm3, %v1638_v11 }
0x15e7   : > { %v1729_v9 = vpop.permute.xlu1 %1728 }
0x15e8   : > { %v1731_v44 = vmul.f32 %v2805_v32, %v1729_v9 }
0x15ea   : > { %v1742_v8 = vcombine.high %v1731_v44, %v1731_v44  ;;  %v1749_v45 = vrot.slane %v1731_v44, %v2662_v61  ;;  %1738 = vrot.lane.b32.xlu0 %v1731_v44, %s2412_s24 }
0x15eb   : > { %v1038_v46 = vpop.permute.xlu1 %1037 }
0x15ec   : > { %v1756_v48 = vrot.slane %v1742_v8, %v2662_v61  ;;  %v1757_v16 = vcombine.high %v1749_v45, %v1749_v45  ;;  %v1765_v49 = vrot.slane %v1749_v45, %v2662_v61  ;;  %1054 = vst.msk [vmem:[%s2516_s11 + $0x3b] sm:$0x1] %vm446_vm3, %v1038_v46 }
0x15ee   : > { %v1779_v50 = vrot.slane %v1757_v16, %v2662_v61  ;;  %v1787_v59 = vcombine.high %v1765_v49, %v1765_v49  ;;  %v1794_v32 = vrot.slane %v1765_v49, %v2679_v10  ;;  %v1758_v22 = vcombine.high %v1756_v48, %v1756_v48 }
0x15ef   : > { %v1226_v41 = vpop.permute.xlu1 %1225  ;;  %v1772_v55 = vrot.slane %v1756_v48, %v2662_v61 }
0x15f0   : > { %1248 = vst.msk [vmem:[%s2516_s11 + $0xc] sm:$0x1] %vm446_vm3, %v1226_v41  ;;  %v1798_v52 = vrot.slane %v1779_v50, %v2679_v10  ;;  %v1789_v53 = vcombine.high %v1779_v50, %v1779_v50  ;;  %1823 = vrot.lane.b32.xlu0 %v1794_v32, %s2412_s24  ;;  %v1802_v54 = vrot.slane %v1787_v59, %v2679_v10 }
0x15f1   : > { %v1786_v57 = vrot.slane %v1758_v22, %v2662_v61  ;;  %v1810_v34 = vrot.slane %v1772_v55, %v2679_v10  ;;  %v1788_v60 = vcombine.high %v1772_v55, %v1772_v55 }
0x15f2   : > { %1825 = vrot.lane.b32.xlu1 %v1798_v52, %s2412_s24  ;;  %v1806_v56 = vrot.slane %v1789_v53, %v2679_v10 }
0x15f3   : > { %v1230_v25 = vpop.permute.xlu1 %1229  ;;  %v1814_v62 = vrot.slane %v1786_v57, %v2679_v10  ;;  %v1790_v39 = vcombine.high %v1786_v57, %v1786_v57  ;;  %v1818_v0 = vrot.slane %v1788_v60, %v2679_v10 }
0x15f4   : > { %1250 = vst.msk [vmem:[%s2516_s11 + $0x1c] sm:$0x1] %vm446_vm3, %v1230_v25  ;;  %1827 = vrot.lane.b32.xlu0 %v1802_v54, %s2412_s24 }
0x15f5   : > { %v1822_v4 = vrot.slane %v1790_v39, %v2679_v10 }
0x15f6   : > { %1829 = vrot.lane.b32.xlu1 %v1806_v56, %s2412_s24 }
0x15f7   : > { %v1232_v58 = vpop.permute.xlu1 %1231 }
0x15f8   : > { %1251 = vst.msk [vmem:[%s2516_s11 + $0x24] sm:$0x1] %vm446_vm3, %v1232_v58  ;;  %1831 = vrot.lane.b32.xlu0 %v1810_v34, %s2412_s24 }
0x15fa   : > { %1833 = vrot.lane.b32.xlu1 %v1814_v62, %s2412_s24 }
0x15fb   : > { %v1236_v61 = vpop.permute.xlu1 %1235 }
0x15fc   : > { %1253 = vst.msk [vmem:[%s2516_s11 + $0x34] sm:$0x1] %vm446_vm3, %v1236_v61  ;;  %1835 = vrot.lane.b32.xlu0 %v1818_v0, %s2412_s24 }
0x15fe   : > { %1837 = vrot.lane.b32.xlu1 %v1822_v4, %s2412_s24 }
0x15ff   : > { %v1424_v5 = vpop.permute.xlu1 %1423 }
0x1600   : > { %1447 = vst.msk [vmem:[%s2516_s11 + $0x5] sm:$0x1] %vm446_vm3, %v1424_v5 }
0x1603   : > { %v1428_v7 = vpop.permute.xlu1 %1427 }
0x1604   : > { %1449 = vst.msk [vmem:[%s2516_s11 + $0x15] sm:$0x1] %vm446_vm3, %v1428_v7 }
0x1607   : > { %v1432_v47 = vpop.permute.xlu1 %1431 }
0x1608   : > { %1451 = vst.msk [vmem:[%s2516_s11 + $0x25] sm:$0x1] %vm446_vm3, %v1432_v47 }
0x160b   : > { %v1436_v12 = vpop.permute.xlu1 %1435 }
0x160c   : > { %1453 = vst.msk [vmem:[%s2516_s11 + $0x35] sm:$0x1] %vm446_vm3, %v1436_v12 }
0x160f   : > { %v1624_v13 = vpop.permute.xlu1 %1623 }
0x1610   : > { %1647 = vst.msk [vmem:[%s2516_s11 + $0x6] sm:$0x1] %vm446_vm3, %v1624_v13 }
0x1613   : > { %v1628_v10 = vpop.permute.xlu1 %1627 }
0x1614   : > { %1649 = vst.msk [vmem:[%s2516_s11 + $0x16] sm:$0x1] %vm446_vm3, %v1628_v10 }
0x1617   : > { %v1632_v6 = vpop.permute.xlu1 %1631 }
0x1618   : > { %1651 = vst.msk [vmem:[%s2516_s11 + $0x26] sm:$0x1] %vm446_vm3, %v1632_v6 }
0x161b   : > { %v1636_v26 = vpop.permute.xlu1 %1635 }
0x161c   : > { %1653 = vst.msk [vmem:[%s2516_s11 + $0x36] sm:$0x1] %vm446_vm3, %v1636_v26 }
0x161f   : > { %v1734_v14 = vpop.permute.xlu1 %1733 }
0x1620   : > { %1736 = vst.msk [vmem:[#allocation6] sm:$0xff] %vm257_vm2, %v1734_v14 }
0x165c   : > { %v1739_v17 = vpop.permute.xlu0 %1738 }
0x165d   : > { %1741 = vst.msk [vmem:[#allocation4] sm:$0xff] %vm257_vm2, %v1739_v17 }
0x165e   : > { %2285 = shalt.err (!%p2282_p7)
}
0x165f   : > { %s2286_s13 = scalar_lea.hbm %s3206_s3, 128 }
0x1660   : > { %p2287_p9 = scmp.ne.s32.totalorder %s3206_s3, %s2286_s13  ;;  %p2292_p12 = scmp.lt.u32.totalorder %s2286_s13, %s3206_s3 }
0x1662   : > { %p2288_p10 = pnand %p2287_p9, %p2482_p2 }
0x1664   : > { %p2289_p11 = pneg %p2288_p10 }
0x1666   : > { %p2294_p13 = pnand %p2292_p12, %p2289_p11 }
0x1668   : > { %2297 = shalt.err (!%p2294_p13)
}
0x1669   : > { %2129 = dma.vmem_to_hbm [thread:$0]  (%p2482_p2), %s1888_s6, 128, %s3206_s3, [#allocation5]  }
0x166a   : > { %s2298_s7 = scalar_lea.vmem %s3082_s8, 128  ;;  %p2305_p5 = scmp.lt.s32.totalorder %s3082_s8, %s3082_s8 }
0x166b   : > { %p2299_p0 = scmp.ne.s32.totalorder %s3082_s8, %s2298_s7  ;;  %p2306_p6 = scmp.lt.s32.totalorder %s2298_s7, %s2298_s7 }
0x166d   : > { %p2300_p1 = pnand %p2299_p0, %p2482_p2  ;;  %p2307_p7 = por %p2306_p6, %p2305_p5 }
0x166f   : > { %p2301_p3 = pneg %p2300_p1 }
0x1671   : > { %p2308_p9 = pnand %p2307_p7, %p2301_p3 }
0x1673   : > { %2311 = shalt.err (!%p2308_p9)
}
0x1674   : > { %s2312_s12 = scalar_lea.hbm %s3207_s4, 128 }
0x1675   : > { %p2313_p10 = scmp.ne.s32.totalorder %s3207_s4, %s2312_s12  ;;  %p2318_p13 = scmp.lt.u32.totalorder %s2312_s12, %s3207_s4 }
0x1677   : > { %p2314_p11 = pnand %p2313_p10, %p2482_p2 }
0x1679   : > { %p2315_p12 = pneg %p2314_p11 }
0x167b   : > { %p2320_p0 = pnand %p2318_p13, %p2315_p12 }
0x167d   : > { %2323 = shalt.err (!%p2320_p0)
}
0x167e   : > { %2131 = dma.vmem_to_hbm [thread:$0]  (%p2482_p2), %s3082_s8, 128, %s3207_s4, [#allocation5]   ;;  %v1824_v18 = vpop.permute.xlu0 %1823  ;;  %v1826_v19 = vpop.permute.xlu1 %1825 }
0x167f   : > { %1847 = vst.msk [vmem:[%s2516_s11 + $0x7] sm:$0x1] %vm446_vm3, %v1824_v18  ;;  %1848 = vst.msk [vmem:[%s2516_s11 + $0xf] sm:$0x1] %vm446_vm3, %v1826_v19  ;;  %s2032_s27 = sshll.u32 %s2398_s18, 7  ;;  %s1871_s5 = sshll.u32 %s2516_s11, 4  ;;  %s3145_s5 = int_to_ptr.vmem [resolvable:$true] %s1871_s5 }
0x1680   : > { %s3143_s9 = scalar_lea.hbm %s3205_s2, %s2032_s27  ;;  %s3153_s18 = scalar_lea.sflag [#allocation3], %s213_s30 }
0x1681   : > { %s2324_s10 = scalar_lea.vmem %s3145_s5, 1024  ;;  %s2417_s12 = smov [#allocation2]  }
0x1682   : > { %v1828_v20 = vpop.permute.xlu0 %1827  ;;  %v1830_v1 = vpop.permute.xlu1 %1829  ;;  %p2325_p1 = scmp.ne.s32.totalorder %s3145_s5, %s2324_s10  ;;  %s2328_s13 = sshll.u32 %s2417_s12, 4  ;;  %s2329_s13 = int_to_ptr.vmem [resolvable:$false] %s2328_s13 }
0x1683   : > { %1849 = vst.msk [vmem:[%s2516_s11 + $0x17] sm:$0x1] %vm446_vm3, %v1828_v20  ;;  %1850 = vst.msk [vmem:[%s2516_s11 + $0x1f] sm:$0x1] %vm446_vm3, %v1830_v1  ;;  %s2330_s14 = scalar_lea.vmem %s2329_s13, 2048  ;;  %p2331_p6 = scmp.lt.s32.totalorder %s3145_s5, %s2329_s13 }
0x1684   : > { %p2326_p3 = pnand %p2325_p1, %p2492_p4  ;;  %p2332_p7 = scmp.lt.s32.totalorder %s2330_s14, %s2324_s10 }
0x1686   : > { %v1832_v21 = vpop.permute.xlu0 %1831  ;;  %v1834_v23 = vpop.permute.xlu1 %1833  ;;  %p2327_p5 = pneg %p2326_p3  ;;  %p2333_p9 = por %p2332_p7, %p2331_p6 }
0x1687   : > { %1851 = vst.msk [vmem:[%s2516_s11 + $0x27] sm:$0x1] %vm446_vm3, %v1832_v21  ;;  %1852 = vst.msk [vmem:[%s2516_s11 + $0x2f] sm:$0x1] %vm446_vm3, %v1834_v23 }
0x1688   : > { %p2334_p10 = pnand %p2333_p9, %p2327_p5 }
0x168a   : > { %v1836_v2 = vpop.permute.xlu0 %1835  ;;  %v1838_v3 = vpop.permute.xlu1 %1837 }
0x168b   : > { %1853 = vst.msk [vmem:[%s2516_s11 + $0x37] sm:$0x1] %vm446_vm3, %v1836_v2  ;;  %1854 = vst.msk [vmem:[%s2516_s11 + $0x3f] sm:$0x1] %vm446_vm3, %v1838_v3 }
0x168c   : > { %2337 = shalt.err (!%p2334_p10)
}
0x168d   : > { %s2338_s30 = scalar_lea.hbm %s3143_s9, 1024  ;;  %s2342_s21 = scalar_lea.hbm %s3205_s2, 2048 }
0x168e   : > { %p2339_p11 = scmp.ne.s32.totalorder %s3143_s9, %s2338_s30  ;;  %p2343_p0 = scmp.lt.u32.totalorder %s3143_s9, %s3205_s2 }
0x168f   : > { %p2344_p1 = scmp.lt.u32.totalorder %s2342_s21, %s2338_s30  ;;  %p2346_p5 = scmp.lt.u32.totalorder %s2338_s30, %s3143_s9 }
0x1690   : > { %p2340_p12 = pnand %p2339_p11, %p2492_p4 }
0x1691   : > { %p2345_p3 = por %p2344_p1, %p2343_p0 }
0x1692   : > { %p2341_p13 = pneg %p2340_p12 }
0x1693   : > { %p2347_p6 = por %p2346_p5, %p2345_p3 }
0x1695   : > { %p2348_p7 = pnand %p2347_p6, %p2341_p13 }
0x1697   : > { %2351 = shalt.err (!%p2348_p7)
}
0x1698   : > { %s2418_s27 = smov 128   ;;  %s2419_s8 = smov 256  }
0x1699   : > { %s2420_s7 = smov 8  }
0x169a   : > { %2127 = dma.vmem_to_hbm [thread:$0]  (%p2492_p4), %s3145_s5, 1024, %s3143_s9, %s3153_s18, %s2418_s27, %s2419_s8, %s2420_s7  }
0x169b   : > { %2377 = dma.done.wait (%p2482_p2), [#allocation5], 256  }
0x169c   : > { %2379 = vsyncadd (%p2482_p2), [#allocation5], 4294967040 }
0x169d PF: > { %p2145_p9 = scmp.ge.s32.totalorder %s2406_s20, 2  ;;  %s1920_s10 = sand.u32 1, %s2386_s15  }
0x169e   : > { %s1921_s12 = scalar_lea.sflag [#allocation3], %s1920_s10 }
0x169f   : > { %p2138_p10 = pnand %p2145_p9, %p2499_p8 }
0x16a1   : > { %2381 = dma.done.wait (!%p2138_p10), %s1921_s12, 1024  }
0x16a2   : > { %2383 = vsyncadd (!%p2138_p10), %s1921_s12, 4294966272  ;;  %s19_s20 = sadd.s32 1, %s2406_s20   ;;  %s3211_s15 = smov %s2390_s16 }
0x16a3   : > { %p16_p11 = scmp.ge.s32.totalorder %s19_s20, 4   ;;  %s3212_s16 = smov %s2394_s17 }
0x16a4   : > { %s3213_s17 = smov %s2505_s29  ;;  %s3214_s18 = smov %s2402_s19 }
0x16a5   : > { %s3215_s19 = smov %s3217_s23  ;;  %18 = sbr.rel (!%p16_p11) target bundleno = 5 (0x5), region = 92 }
0x16ac   :  { %1926 = vsyncpa [#allocation3], 1 }
0x16ad   :  { %1928 = vsyncpa [#allocation3 + $0x1], 1 }
0x16ae   :  { %1929 = vsyncpa [#allocation5], 1 }

</bundles_post_ra>
